<compile_context>
chip_gen: v7x
topology: tpu7x:2x2x1
jax: 0.10.0
libtpu: 0.0.40
codegen_flags: <defaults>
</compile_context>

<pallas_src>
import functools
import math

import jax
import jax.numpy as jnp
from jax.experimental import pallas as pl
from jax.experimental.pallas import tpu as pltpu

ATT_EPS = 1e-7


def _round_up(n, m):
    return ((n + m - 1) // m) * m


def dlsa_kernel(x_ref, bn_scale_ref, bn_shift_ref, conv_w_ref,
                att_w_ref, att_b_ref, cla_w_ref, cla_b_ref, out_ref,
                *, b_tile, t):
    """Processes B_TILE samples per grid step.

    x_ref:        (B_TILE*T, Hp) f32   flattened (sample, time) rows, channel-padded to Hp
    bn_scale_ref: (L+1, Hp)     f32    per-channel BN scale (gamma / sqrt(var + eps)), zero-padded
    bn_shift_ref: (L+1, Hp)     f32    per-channel BN shift (beta - mean * scale), zero-padded
    conv_w_ref:   (L, Hp, Hp)   bf16   1x1-conv weights, (in, out), zero-padded
    att_w_ref:    (Hp, Kp)      bf16   attention conv weight (transposed), att_b_ref: (1, Kp) f32
    cla_w_ref:    (Hp, Kp)      bf16   classifier conv weight (transposed), cla_b_ref: (1, Kp) f32
    out_ref:      (1, B_TILE, Kp) f32  per-block output
    """
    x = x_ref[...]                                    # (M, Hp), M = B_TILE * T
    residual = x                                      # residual taken BEFORE batchnorm[0]

    # --- EmbeddingLayers ---
    out = x * bn_scale_ref[0][None, :] + bn_shift_ref[0][None, :]
    n_layers = conv_w_ref.shape[0]
    for i in range(n_layers):                         # small static unrolled loop
        h = jnp.dot(out.astype(jnp.bfloat16), conv_w_ref[i],
                    preferred_element_type=jnp.float32)            # (M, Hp) on the MXU
        h = h * bn_scale_ref[i + 1][None, :] + bn_shift_ref[i + 1][None, :]
        out = jnp.maximum(h, 0.0)                     # ReLU; dropout is identity in eval mode
    out = out + residual                              # requires freq_bins == hidden_units

    # --- Attention head ---
    out_bf = out.astype(jnp.bfloat16)
    att = jax.nn.sigmoid(
        jnp.dot(out_bf, att_w_ref[...], preferred_element_type=jnp.float32) + att_b_ref[...])
    cla = jax.nn.sigmoid(
        jnp.dot(out_bf, cla_w_ref[...], preferred_element_type=jnp.float32) + cla_b_ref[...])

    att = jnp.clip(att, ATT_EPS, 1.0 - ATT_EPS)
    kp = att.shape[-1]
    att3 = att.reshape(b_tile, t, kp)                 # split (sample, time); lane dim untouched
    cla3 = cla.reshape(b_tile, t, kp)
    den = jnp.sum(att3, axis=1)                       # (B_TILE, Kp)  sum over time
    num = jnp.sum(att3 * cla3, axis=1)                # (B_TILE, Kp)
    # sum_t(att/den * cla) == sum_t(att*cla) / den; reciprocal goes to the EUP slot.
    y = num * pl.reciprocal(den, approx=True)
    y = jnp.clip(y, 0.0, 1.0)                         # F.hardtanh(x, 0, 1)
    out_ref[0] = y


def decision_level_single_attention(x, bn_scale, bn_shift, conv_w,
                                     att_w, att_b, cla_w, cla_b, *, b_tile=4):
    B, T, F = x.shape
    Lp1, H = bn_scale.shape
    L = conv_w.shape[0]
    K = att_w.shape[1]
    assert F == H, "residual add requires freq_bins == hidden_units"

    # Lane-dense padded sizes (zero padding is exact: padded channels/classes stay 0 end-to-end
    # and are sliced off before returning).
    Hp = _round_up(H, 128)
    Kp = _round_up(K, 128)

    # Keep at least 2 grid steps when B >= 2 so the "parallel" axis can span both v7x TCs.
    b_tile = max(1, min(b_tile, B))
    if B >= 2 and b_tile > B // 2:
        b_tile = max(1, B // 2)
    assert (b_tile * T) % 8 == 0, "b_tile * time_steps must be a multiple of 8 (sublane tile)"
    Bp = _round_up(B, b_tile)
    num_blocks = Bp // b_tile
    M = b_tile * T

    f32, bf16 = jnp.float32, jnp.bfloat16
    x_p = jnp.zeros((Bp, T, Hp), f32).at[:B, :, :F].set(x.astype(f32)).reshape(Bp * T, Hp)
    bn_scale_p = jnp.zeros((Lp1, Hp), f32).at[:, :H].set(bn_scale)
    bn_shift_p = jnp.zeros((Lp1, Hp), f32).at[:, :H].set(bn_shift)
    conv_w_p = jnp.zeros((L, Hp, Hp), bf16).at[:, :H, :H].set(conv_w.astype(bf16))
    att_w_p = jnp.zeros((Hp, Kp), bf16).at[:H, :K].set(att_w.astype(bf16))
    cla_w_p = jnp.zeros((Hp, Kp), bf16).at[:H, :K].set(cla_w.astype(bf16))
    att_b_p = jnp.zeros((1, Kp), f32).at[:, :K].set(att_b)
    cla_b_p = jnp.zeros((1, Kp), f32).at[:, :K].set(cla_b)

    # VMEM budget: BlockSpec double-buffers every operand.
    block_bytes = (M * Hp * 4                  # x block (f32)
                   + 2 * Lp1 * Hp * 4          # bn scale/shift
                   + L * Hp * Hp * 2           # conv weights (bf16)
                   + 2 * Hp * Kp * 2           # att/cla weights (bf16)
                   + 2 * Kp * 4                # biases
                   + b_tile * Kp * 4)          # output block
    vmem_needed = 2 * block_bytes
    vmem_limit = None
    if vmem_needed > (32 << 20):
        vmem_limit = min(vmem_needed + (4 << 20), 64 << 20)   # cap at v7x physical VMEM
    # TODO(synk): for very large hidden_units (H >= ~1024) keep conv_w in HBM
    #             (memory_space=pl.ANY) and DMA one (H, H) layer at a time with
    #             pltpu.make_async_copy instead of pulling all L layers per step.

    kernel = functools.partial(dlsa_kernel, b_tile=b_tile, t=T)
    out = pl.pallas_call(
        kernel,
        out_shape=jax.ShapeDtypeStruct((num_blocks, b_tile, Kp), jnp.float32),
        grid=(num_blocks,),
        in_specs=[
            pl.BlockSpec((M, Hp), lambda b: (b, 0)),
            pl.BlockSpec((Lp1, Hp), lambda b: (0, 0)),
            pl.BlockSpec((Lp1, Hp), lambda b: (0, 0)),
            pl.BlockSpec((L, Hp, Hp), lambda b: (0, 0, 0)),
            pl.BlockSpec((Hp, Kp), lambda b: (0, 0)),
            pl.BlockSpec((1, Kp), lambda b: (0, 0)),
            pl.BlockSpec((Hp, Kp), lambda b: (0, 0)),
            pl.BlockSpec((1, Kp), lambda b: (0, 0)),
        ],
        out_specs=pl.BlockSpec((1, b_tile, Kp), lambda b: (b, 0, 0)),
        compiler_params=pltpu.CompilerParams(
            dimension_semantics=("parallel",),
            vmem_limit_bytes=vmem_limit),
    )(x_p, bn_scale_p, bn_shift_p, conv_w_p, att_w_p, att_b_p, cla_w_p, cla_b_p)
    return out.reshape(Bp, Kp)[:B, :K]


def reference_forward(x, bn_scale, bn_shift, conv_w, att_w, att_b, cla_w, cla_b,
                      matmul_dtype=jnp.float32):
    """Pure-JAX reference of the same (eval-mode) forward pass.

    matmul_dtype=bfloat16 mirrors the kernel's mixed-precision matmuls (f32 accumulation)."""
    residual = x
    out = x * bn_scale[0] + bn_shift[0]
    for i in range(conv_w.shape[0]):
        h = jnp.einsum('btf,fh->bth', out.astype(matmul_dtype), conv_w[i].astype(matmul_dtype),
                       preferred_element_type=jnp.float32)
        h = h * bn_scale[i + 1] + bn_shift[i + 1]
        out = jax.nn.relu(h)
    out = out + residual
    att = jax.nn.sigmoid(
        jnp.einsum('bth,hk->btk', out.astype(matmul_dtype), att_w.astype(matmul_dtype),
                   preferred_element_type=jnp.float32) + att_b)
    cla = jax.nn.sigmoid(
        jnp.einsum('bth,hk->btk', out.astype(matmul_dtype), cla_w.astype(matmul_dtype),
                   preferred_element_type=jnp.float32) + cla_b)
    att = jnp.clip(att, ATT_EPS, 1.0 - ATT_EPS)
    norm_att = att / jnp.sum(att, axis=1, keepdims=True)
    y = jnp.sum(norm_att * cla, axis=1)
    return jnp.clip(y, 0.0, 1.0)


def _init_conv_weight(key, n_out, n_in):
    """Matches init_layer() for a (n_out, n_in, 1, 1) conv: uniform(-scale, scale)."""
    n = n_in * 1 * 1
    std = math.sqrt(2.0 / n)
    scale = std * math.sqrt(3.0)
    return jax.random.uniform(key, (n_out, n_in), jnp.float32, -scale, scale)


if __name__ == "__main__":
    # Small, module-consistent shapes.
    batch = 8
    time_steps = 16
    freq_bins = 32
    hidden_units = 32          # must equal freq_bins for the residual connection
    classes_num = 10
    emb_layers = 3
    bn_eps = 1e-5
    b_tile = 4                 # 4 samples per grid step -> grid of 2 (both v7x TCs busy)

    key = jax.random.PRNGKey(0)
    k_x, k_conv, k_att, k_cla = jax.random.split(key, 4)

    # Input: (samples_num, time_steps, freq_bins)
    x = jax.random.normal(k_x, (batch, time_steps, freq_bins), jnp.float32)

    # EmbeddingLayers 1x1-conv weights (no bias), pre-transposed to (in, out).
    conv_keys = jax.random.split(k_conv, emb_layers)
    conv_w = jnp.stack([
        _init_conv_weight(conv_keys[i],
                          hidden_units,
                          freq_bins if i == 0 else hidden_units).T     # (in, out)
        for i in range(emb_layers)
    ], axis=0)                                                          # (L, H, H)

    # BatchNorm2d params (eval mode): gamma=1, beta=0, running_mean=0, running_var=1.
    gamma = jnp.ones((emb_layers + 1, hidden_units), jnp.float32)
    beta = jnp.zeros((emb_layers + 1, hidden_units), jnp.float32)
    run_mean = jnp.zeros((emb_layers + 1, hidden_units), jnp.float32)
    run_var = jnp.ones((emb_layers + 1, hidden_units), jnp.float32)
    bn_scale = gamma / jnp.sqrt(run_var + bn_eps)
    bn_shift = beta - run_mean * bn_scale
    # TODO(synk): training-mode BatchNorm (batch statistics) and dropout randomness are not
    #             reproduced; this kernel implements deterministic eval-mode semantics.

    # Attention head: 1x1 convs with bias (bias filled to 0 by init_layer).
    att_w = _init_conv_weight(k_att, classes_num, hidden_units).T       # (H, K)
    att_b = jnp.zeros((1, classes_num), jnp.float32)
    cla_w = _init_conv_weight(k_cla, classes_num, hidden_units).T       # (H, K)
    cla_b = jnp.zeros((1, classes_num), jnp.float32)

    out = decision_level_single_attention(x, bn_scale, bn_shift, conv_w,
                                          att_w, att_b, cla_w, cla_b, b_tile=b_tile)
    out = jax.block_until_ready(out)
    assert out.shape == (batch, classes_num)

    # Tight check against a reference that mirrors the kernel's bf16 matmul precision.
    ref_bf16 = reference_forward(x, bn_scale, bn_shift, conv_w, att_w, att_b, cla_w, cla_b,
                                 matmul_dtype=jnp.bfloat16)
    assert jnp.allclose(out, ref_bf16, atol=5e-3, rtol=5e-3), "kernel != bf16 reference"

    # Looser sanity check against the pure-f32 module semantics.
    ref_f32 = reference_forward(x, bn_scale, bn_shift, conv_w, att_w, att_b, cla_w, cla_b)
    assert jnp.allclose(out, ref_f32, atol=3e-2, rtol=3e-2), "kernel != f32 reference"

    print("KERNEL_OK")
</pallas_src>

<mosaic_0001>
module attributes {stable_mosaic.version = 11 : i64} {
  func.func @dlsa_kernel(%arg0: i32, %arg1: memref<64x128xf32, #tpu.memory_space<vmem>>, %arg2: memref<4x128xf32, #tpu.memory_space<vmem>>, %arg3: memref<4x128xf32, #tpu.memory_space<vmem>>, %arg4: memref<3x128x128xbf16, #tpu.memory_space<vmem>>, %arg5: memref<128x128xbf16, #tpu.memory_space<vmem>>, %arg6: memref<1x128xf32, #tpu.memory_space<vmem>>, %arg7: memref<128x128xbf16, #tpu.memory_space<vmem>>, %arg8: memref<1x128xf32, #tpu.memory_space<vmem>>, %arg9: memref<1x4x128xf32, #tpu.memory_space<vmem>>) attributes {dimension_semantics = [#tpu.dimension_semantics<parallel>], iteration_bounds = array<i64: 2>, scalar_prefetch = 0 : i64, scratch_operands = 0 : i64, tpu.core_type = #tpu.core_type<tc>, window_params = [{transform_indices = @transform_0, window_bounds = array<i64: 64, 128>}, {pipeline_mode = #tpu.pipeline_mode<synchronous>, transform_indices = @transform_1, window_bounds = array<i64: 4, 128>}, {pipeline_mode = #tpu.pipeline_mode<synchronous>, transform_indices = @transform_2, window_bounds = array<i64: 4, 128>}, {pipeline_mode = #tpu.pipeline_mode<synchronous>, transform_indices = @transform_3, window_bounds = array<i64: 3, 128, 128>}, {pipeline_mode = #tpu.pipeline_mode<synchronous>, transform_indices = @transform_4, window_bounds = array<i64: 128, 128>}, {pipeline_mode = #tpu.pipeline_mode<synchronous>, transform_indices = @transform_5, window_bounds = array<i64: 1, 128>}, {pipeline_mode = #tpu.pipeline_mode<synchronous>, transform_indices = @transform_6, window_bounds = array<i64: 128, 128>}, {pipeline_mode = #tpu.pipeline_mode<synchronous>, transform_indices = @transform_7, window_bounds = array<i64: 1, 128>}, {transform_indices = @transform_8, window_bounds = array<i64: 1, 4, 128>}]} {
    %c0 = arith.constant 0 : index
    %c0_0 = arith.constant 0 : index
    %0 = vector.load %arg1[%c0, %c0_0] : memref<64x128xf32, #tpu.memory_space<vmem>>, vector<64x128xf32>
    %c0_1 = arith.constant 0 : index
    %c0_2 = arith.constant 0 : index
    %1 = vector.load %arg2[%c0_1, %c0_2] : memref<4x128xf32, #tpu.memory_space<vmem>>, vector<1x128xf32>
    %2 = vector.shape_cast %1 : vector<1x128xf32> to vector<128xf32>
    %3 = vector.shape_cast %2 : vector<128xf32> to vector<1x128xf32>
    %4 = vector.broadcast %3 : vector<1x128xf32> to vector<64x128xf32>
    %5 = arith.mulf %0, %4 : vector<64x128xf32>
    %c0_3 = arith.constant 0 : index
    %c0_4 = arith.constant 0 : index
    %6 = vector.load %arg3[%c0_3, %c0_4] : memref<4x128xf32, #tpu.memory_space<vmem>>, vector<1x128xf32>
    %7 = vector.shape_cast %6 : vector<1x128xf32> to vector<128xf32>
    %8 = vector.shape_cast %7 : vector<128xf32> to vector<1x128xf32>
    %9 = vector.broadcast %8 : vector<1x128xf32> to vector<64x128xf32>
    %10 = arith.addf %5, %9 : vector<64x128xf32>
    %11 = arith.truncf %10 : vector<64x128xf32> to vector<64x128xbf16>
    %c0_5 = arith.constant 0 : index
    %c0_6 = arith.constant 0 : index
    %c0_7 = arith.constant 0 : index
    %12 = vector.load %arg4[%c0_5, %c0_6, %c0_7] : memref<3x128x128xbf16, #tpu.memory_space<vmem>>, vector<1x128x128xbf16>
    %13 = vector.shape_cast %12 : vector<1x128x128xbf16> to vector<128x128xbf16>
    %cst = arith.constant dense<0.000000e+00> : vector<64x128xf32>
    %14 = tpu.matmul %11, %13, %cst {dimension_numbers = #tpu.dot_dimension_numbers<[1], [0], [0], [1], [0, 0, 1, 1], [], []>} : vector<64x128xbf16>, vector<128x128xbf16>, vector<64x128xf32> -> vector<64x128xf32>
    %c1 = arith.constant 1 : index
    %c0_8 = arith.constant 0 : index
    %15 = vector.load %arg2[%c1, %c0_8] : memref<4x128xf32, #tpu.memory_space<vmem>>, vector<1x128xf32>
    %16 = vector.shape_cast %15 : vector<1x128xf32> to vector<128xf32>
    %17 = vector.shape_cast %16 : vector<128xf32> to vector<1x128xf32>
    %18 = vector.broadcast %17 : vector<1x128xf32> to vector<64x128xf32>
    %19 = arith.mulf %14, %18 : vector<64x128xf32>
    %c1_9 = arith.constant 1 : index
    %c0_10 = arith.constant 0 : index
    %20 = vector.load %arg3[%c1_9, %c0_10] : memref<4x128xf32, #tpu.memory_space<vmem>>, vector<1x128xf32>
    %21 = vector.shape_cast %20 : vector<1x128xf32> to vector<128xf32>
    %22 = vector.shape_cast %21 : vector<128xf32> to vector<1x128xf32>
    %23 = vector.broadcast %22 : vector<1x128xf32> to vector<64x128xf32>
    %24 = arith.addf %19, %23 : vector<64x128xf32>
    %cst_11 = arith.constant 0.000000e+00 : f32
    %25 = vector.broadcast %cst_11 : f32 to vector<64x128xf32>
    %26 = arith.maximumf %24, %25 : vector<64x128xf32>
    %27 = arith.truncf %26 : vector<64x128xf32> to vector<64x128xbf16>
    %c1_12 = arith.constant 1 : index
    %c0_13 = arith.constant 0 : index
    %c0_14 = arith.constant 0 : index
    %28 = vector.load %arg4[%c1_12, %c0_13, %c0_14] : memref<3x128x128xbf16, #tpu.memory_space<vmem>>, vector<1x128x128xbf16>
    %29 = vector.shape_cast %28 : vector<1x128x128xbf16> to vector<128x128xbf16>
    %cst_15 = arith.constant dense<0.000000e+00> : vector<64x128xf32>
    %30 = tpu.matmul %27, %29, %cst_15 {dimension_numbers = #tpu.dot_dimension_numbers<[1], [0], [0], [1], [0, 0, 1, 1], [], []>} : vector<64x128xbf16>, vector<128x128xbf16>, vector<64x128xf32> -> vector<64x128xf32>
    %c2 = arith.constant 2 : index
    %c0_16 = arith.constant 0 : index
    %31 = vector.load %arg2[%c2, %c0_16] : memref<4x128xf32, #tpu.memory_space<vmem>>, vector<1x128xf32>
    %32 = vector.shape_cast %31 : vector<1x128xf32> to vector<128xf32>
    %33 = vector.shape_cast %32 : vector<128xf32> to vector<1x128xf32>
    %34 = vector.broadcast %33 : vector<1x128xf32> to vector<64x128xf32>
    %35 = arith.mulf %30, %34 : vector<64x128xf32>
    %c2_17 = arith.constant 2 : index
    %c0_18 = arith.constant 0 : index
    %36 = vector.load %arg3[%c2_17, %c0_18] : memref<4x128xf32, #tpu.memory_space<vmem>>, vector<1x128xf32>
    %37 = vector.shape_cast %36 : vector<1x128xf32> to vector<128xf32>
    %38 = vector.shape_cast %37 : vector<128xf32> to vector<1x128xf32>
    %39 = vector.broadcast %38 : vector<1x128xf32> to vector<64x128xf32>
    %40 = arith.addf %35, %39 : vector<64x128xf32>
    %cst_19 = arith.constant 0.000000e+00 : f32
    %41 = vector.broadcast %cst_19 : f32 to vector<64x128xf32>
    %42 = arith.maximumf %40, %41 : vector<64x128xf32>
    %43 = arith.truncf %42 : vector<64x128xf32> to vector<64x128xbf16>
    %c2_20 = arith.constant 2 : index
    %c0_21 = arith.constant 0 : index
    %c0_22 = arith.constant 0 : index
    %44 = vector.load %arg4[%c2_20, %c0_21, %c0_22] : memref<3x128x128xbf16, #tpu.memory_space<vmem>>, vector<1x128x128xbf16>
    %45 = vector.shape_cast %44 : vector<1x128x128xbf16> to vector<128x128xbf16>
    %cst_23 = arith.constant dense<0.000000e+00> : vector<64x128xf32>
    %46 = tpu.matmul %43, %45, %cst_23 {dimension_numbers = #tpu.dot_dimension_numbers<[1], [0], [0], [1], [0, 0, 1, 1], [], []>} : vector<64x128xbf16>, vector<128x128xbf16>, vector<64x128xf32> -> vector<64x128xf32>
    %c3 = arith.constant 3 : index
    %c0_24 = arith.constant 0 : index
    %47 = vector.load %arg2[%c3, %c0_24] : memref<4x128xf32, #tpu.memory_space<vmem>>, vector<1x128xf32>
    %48 = vector.shape_cast %47 : vector<1x128xf32> to vector<128xf32>
    %49 = vector.shape_cast %48 : vector<128xf32> to vector<1x128xf32>
    %50 = vector.broadcast %49 : vector<1x128xf32> to vector<64x128xf32>
    %51 = arith.mulf %46, %50 : vector<64x128xf32>
    %c3_25 = arith.constant 3 : index
    %c0_26 = arith.constant 0 : index
    %52 = vector.load %arg3[%c3_25, %c0_26] : memref<4x128xf32, #tpu.memory_space<vmem>>, vector<1x128xf32>
    %53 = vector.shape_cast %52 : vector<1x128xf32> to vector<128xf32>
    %54 = vector.shape_cast %53 : vector<128xf32> to vector<1x128xf32>
    %55 = vector.broadcast %54 : vector<1x128xf32> to vector<64x128xf32>
    %56 = arith.addf %51, %55 : vector<64x128xf32>
    %cst_27 = arith.constant 0.000000e+00 : f32
    %57 = vector.broadcast %cst_27 : f32 to vector<64x128xf32>
    %58 = arith.maximumf %56, %57 : vector<64x128xf32>
    %59 = arith.addf %58, %0 : vector<64x128xf32>
    %60 = arith.truncf %59 : vector<64x128xf32> to vector<64x128xbf16>
    %c0_28 = arith.constant 0 : index
    %c0_29 = arith.constant 0 : index
    %61 = vector.load %arg5[%c0_28, %c0_29] : memref<128x128xbf16, #tpu.memory_space<vmem>>, vector<128x128xbf16>
    %cst_30 = arith.constant dense<0.000000e+00> : vector<64x128xf32>
    %62 = tpu.matmul %60, %61, %cst_30 {dimension_numbers = #tpu.dot_dimension_numbers<[1], [0], [0], [1], [0, 0, 1, 1], [], []>} : vector<64x128xbf16>, vector<128x128xbf16>, vector<64x128xf32> -> vector<64x128xf32>
    %c0_31 = arith.constant 0 : index
    %c0_32 = arith.constant 0 : index
    %63 = vector.load %arg6[%c0_31, %c0_32] : memref<1x128xf32, #tpu.memory_space<vmem>>, vector<1x128xf32>
    %64 = vector.broadcast %63 : vector<1x128xf32> to vector<64x128xf32>
    %65 = arith.addf %62, %64 : vector<64x128xf32>
    %66 = arith.negf %65 : vector<64x128xf32>
    %67 = math.exp %66 : vector<64x128xf32>
    %cst_33 = arith.constant 1.000000e+00 : f32
    %68 = vector.broadcast %cst_33 : f32 to vector<64x128xf32>
    %69 = arith.addf %68, %67 : vector<64x128xf32>
    %70 = arith.divf %68, %69 : vector<64x128xf32>
    %c0_34 = arith.constant 0 : index
    %c0_35 = arith.constant 0 : index
    %71 = vector.load %arg7[%c0_34, %c0_35] : memref<128x128xbf16, #tpu.memory_space<vmem>>, vector<128x128xbf16>
    %cst_36 = arith.constant dense<0.000000e+00> : vector<64x128xf32>
    %72 = tpu.matmul %60, %71, %cst_36 {dimension_numbers = #tpu.dot_dimension_numbers<[1], [0], [0], [1], [0, 0, 1, 1], [], []>} : vector<64x128xbf16>, vector<128x128xbf16>, vector<64x128xf32> -> vector<64x128xf32>
    %c0_37 = arith.constant 0 : index
    %c0_38 = arith.constant 0 : index
    %73 = vector.load %arg8[%c0_37, %c0_38] : memref<1x128xf32, #tpu.memory_space<vmem>>, vector<1x128xf32>
    %74 = vector.broadcast %73 : vector<1x128xf32> to vector<64x128xf32>
    %75 = arith.addf %72, %74 : vector<64x128xf32>
    %76 = arith.negf %75 : vector<64x128xf32>
    %77 = math.exp %76 : vector<64x128xf32>
    %cst_39 = arith.constant 1.000000e+00 : f32
    %78 = vector.broadcast %cst_39 : f32 to vector<64x128xf32>
    %79 = arith.addf %78, %77 : vector<64x128xf32>
    %80 = arith.divf %78, %79 : vector<64x128xf32>
    %cst_40 = arith.constant 1.000000e-07 : f32
    %cst_41 = arith.constant 0.99999988 : f32
    %81 = vector.broadcast %cst_40 : f32 to vector<64x128xf32>
    %82 = arith.maximumf %81, %70 : vector<64x128xf32>
    %83 = vector.broadcast %cst_41 : f32 to vector<64x128xf32>
    %84 = arith.minimumf %83, %82 : vector<64x128xf32>
    %85 = vector.shape_cast %84 : vector<64x128xf32> to vector<4x16x128xf32>
    %86 = vector.shape_cast %80 : vector<64x128xf32> to vector<4x16x128xf32>
    %cst_42 = arith.constant dense<0.000000e+00> : vector<4x128xf32>
    %87 = vector.multi_reduction <add>, %85, %cst_42 [1] : vector<4x16x128xf32> to vector<4x128xf32>
    %88 = arith.mulf %85, %86 : vector<4x16x128xf32>
    %cst_43 = arith.constant dense<0.000000e+00> : vector<4x128xf32>
    %89 = vector.multi_reduction <add>, %88, %cst_43 [1] : vector<4x16x128xf32> to vector<4x128xf32>
    %90 = tpu.reciprocal %87 {approx = true} : vector<4x128xf32> -> vector<4x128xf32>
    %91 = arith.mulf %89, %90 : vector<4x128xf32>
    %cst_44 = arith.constant 0.000000e+00 : f32
    %cst_45 = arith.constant 1.000000e+00 : f32
    %92 = vector.broadcast %cst_44 : f32 to vector<4x128xf32>
    %93 = arith.maximumf %92, %91 : vector<4x128xf32>
    %94 = vector.broadcast %cst_45 : f32 to vector<4x128xf32>
    %95 = arith.minimumf %94, %93 : vector<4x128xf32>
    %c0_46 = arith.constant 0 : index
    %c0_47 = arith.constant 0 : index
    %c0_48 = arith.constant 0 : index
    %96 = vector.load %arg9[%c0_46, %c0_47, %c0_48] : memref<1x4x128xf32, #tpu.memory_space<vmem>>, vector<1x4x128xf32>
    %97 = vector.shape_cast %96 : vector<1x4x128xf32> to vector<4x128xf32>
    %98 = vector.shape_cast %95 : vector<4x128xf32> to vector<1x4x128xf32>
    tpu.vector_store %arg9[%c0_46, %c0_47, %c0_48], %98 {strides = array<i32>} : memref<1x4x128xf32, #tpu.memory_space<vmem>>, vector<1x4x128xf32>,
    return
  }
  func.func @transform_0(%arg0: i32) -> (i32, i32) {
    %c0_i32 = arith.constant 0 : i32
    %c0_i32_0 = arith.constant 0 : i32
    return %arg0, %c0_i32 : i32, i32
  }
  func.func @transform_1(%arg0: i32) -> (i32, i32) {
    %c0_i32 = arith.constant 0 : i32
    %c0_i32_0 = arith.constant 0 : i32
    %c0_i32_1 = arith.constant 0 : i32
    return %c0_i32, %c0_i32_0 : i32, i32
  }
  func.func @transform_2(%arg0: i32) -> (i32, i32) {
    %c0_i32 = arith.constant 0 : i32
    %c0_i32_0 = arith.constant 0 : i32
    %c0_i32_1 = arith.constant 0 : i32
    return %c0_i32, %c0_i32_0 : i32, i32
  }
  func.func @transform_3(%arg0: i32) -> (i32, i32, i32) {
    %c0_i32 = arith.constant 0 : i32
    %c0_i32_0 = arith.constant 0 : i32
    %c0_i32_1 = arith.constant 0 : i32
    %c0_i32_2 = arith.constant 0 : i32
    return %c0_i32, %c0_i32_0, %c0_i32_1 : i32, i32, i32
  }
  func.func @transform_4(%arg0: i32) -> (i32, i32) {
    %c0_i32 = arith.constant 0 : i32
    %c0_i32_0 = arith.constant 0 : i32
    %c0_i32_1 = arith.constant 0 : i32
    return %c0_i32, %c0_i32_0 : i32, i32
  }
  func.func @transform_5(%arg0: i32) -> (i32, i32) {
    %c0_i32 = arith.constant 0 : i32
    %c0_i32_0 = arith.constant 0 : i32
    %c0_i32_1 = arith.constant 0 : i32
    return %c0_i32, %c0_i32_0 : i32, i32
  }
  func.func @transform_6(%arg0: i32) -> (i32, i32) {
    %c0_i32 = arith.constant 0 : i32
    %c0_i32_0 = arith.constant 0 : i32
    %c0_i32_1 = arith.constant 0 : i32
    return %c0_i32, %c0_i32_0 : i32, i32
  }
  func.func @transform_7(%arg0: i32) -> (i32, i32) {
    %c0_i32 = arith.constant 0 : i32
    %c0_i32_0 = arith.constant 0 : i32
    %c0_i32_1 = arith.constant 0 : i32
    return %c0_i32, %c0_i32_0 : i32, i32
  }
  func.func @transform_8(%arg0: i32) -> (i32, i32, i32) {
    %c0_i32 = arith.constant 0 : i32
    %c0_i32_0 = arith.constant 0 : i32
    %c0_i32_1 = arith.constant 0 : i32
    return %arg0, %c0_i32, %c0_i32_0 : i32, i32, i32
  }
}

</mosaic_0001>

<bundles_post_ra>
// kernel: tpu_custom_call.1
= control target key start
LH: loop header
LB: loop body
LE: loop exit
PB: predicated region body
PF: predicated region fallthrough
CT: control target
= control target key end

     0   :  { %s2693_s0 = inlined_call_operand.hbm [shape: f32[128,128], index: 0, kind: input, shape index: {}]   ;;  %s2694_s1 = inlined_call_operand.hbm [shape: f32[4,128], index: 1, kind: input, shape index: {}]   ;;  %s2695_s2 = inlined_call_operand.vmem [shape: f32[4,128], index: 2, kind: input, shape index: {}]   ;;  %s2696_s3 = inlined_call_operand.hbm [shape: bf16[3,128,128], index: 3, kind: input, shape index: {}]   ;;  %s2697_s4 = inlined_call_operand.hbm [shape: bf16[128,128], index: 4, kind: input, shape index: {}]   ;;  %s2698_s5 = inlined_call_operand.vmem [shape: f32[1,128], index: 5, kind: input, shape index: {}]   ;;  %s2699_s6 = inlined_call_operand.hbm [shape: bf16[128,128], index: 6, kind: input, shape index: {}]   ;;  %s2700_s7 = inlined_call_operand.vmem [shape: f32[1,128], index: 7, kind: input, shape index: {}]   ;;  %s2701_s8 = inlined_call_operand.hbm [shape: f32[2,4,128], index: 8, kind: output, shape index: {}]  }
   0x1   :  { %2705 = sst [smem:[#allocation16_spill]] %s2694_s1 }
   0x2   :  { %2706 = sst [smem:[#allocation17_spill]] %s2697_s4 }
   0x3   :  { %13 = vsyncpa [#allocation3], 0 }
   0x4   :  { %15 = vsyncpa [#allocation3 + $0x1], 0 }
   0x5   :  { %16 = vsyncpa [#allocation6], 0 }
   0x6   :  { %17 = vsyncpa [#allocation9], 0 }
   0x7   :  { %18 = vsyncpa [#allocation4], 0 }
   0x8   :  { %20 = vsyncpa [#allocation4 + $0x1], 0  ;;  %s2289_s27 = smov 0   ;;  %s2291_s28 = smov 0  }
   0x9   :  { %s2293_s29 = smov 0   ;;  %s2295_s30 = smov 0  }
   0xa LB: > { %s2310_s9 = sadd.s32 4294967295, %s2232_s30   ;;  %s1529_s10 = sadd.s32 4294967294, %s2232_s30   ;;  %s2232_s30 = sphi %s2295_s30, %s2728_s30   ;;  %s2228_s29 = sphi %s2293_s29, %s2727_s29   ;;  %s2224_s28 = sphi %s2291_s28, %s2726_s28   ;;  %s2220_s27 = sphi %s2289_s27, %s2725_s27  }
   0xb   : > { %p46_p0 = scmp.ne.s32.totalorder %s2224_s28, %s2220_s27  ;;  %p2702_p1 = scmp.eq.s32.totalorder %s2310_s9, 0 }
   0xc   : > { %p223_p3 = scmp.eq.s32.totalorder %s1529_s10, 1  ;;  %p1530_p5 = scmp.ge.s32.totalorder %s2232_s30, 1 }
   0xd   : > { %p2319_p4 = por %p2702_p1, %p46_p0  ;;  %p230_p7 = scmp.lt.s32.totalorder %s2232_s30, 3 }
   0xe   : > { %p2324_p6 = por %p223_p3, %p46_p0  ;;  %s2234_s14 = smov [#allocation5]  }
   0xf   : > { %s2707_s11 = scalar_select %p2319_p4, 1, 0 }
  0x10   : > { %s2708_s12 = scalar_select %p2324_p6, 1, 0 }
  0x11   : > { %p2329_p8 = pnand %p1530_p5, %p230_p7  ;;  %s243_s15 = sshll.u32 %s2234_s14, 4  ;;  %s244_s15 = int_to_ptr.vmem [resolvable:$true] %s243_s15 }
  0x12   : > { %s2235_s17 = smov [#allocation8]   ;;  %s2236_s19 = smov [#allocation7]  }
  0x13   : > { %s2709_s13 = scalar_select %p2329_p8, 1, 0 }
  0x14   : > { %p1833_p10 = pneg %p2329_p8  ;;  %s269_s18 = sshll.u32 %s2235_s17, 4  ;;  %s2342_s18 = int_to_ptr.vmem [resolvable:$true] %s269_s18 }
  0x15   : > { %s2344_s20 = sshll.u32 %s2236_s19, 4  ;;  %s2711_s1 = sld [smem:[#allocation16_spill]]  ;;  %s257_s20 = int_to_ptr.vmem [resolvable:$true] %s2344_s20 }
  0x16   : > { %p2338_p11 = pnand %p1833_p10, %p2702_p1 }
  0x18   : > { %p2354_p13 = pneg %p2338_p11 }
  0x1b   : > { %s2016_s23 = scalar_lea.hbm %s2711_s1, 64 }
  0x1c   : > { %p2017_p12 = scmp.ne.s32.totalorder %s2711_s1, %s2016_s23  ;;  %p2023_p5 = scmp.lt.u32.totalorder %s2016_s23, %s2711_s1 }
  0x1e   : > { %p2019_p0 = pnand %p2354_p13, %p2017_p12 }
  0x20   : > { %p2020_p3 = pneg %p2019_p0 }
  0x22   : > { %p2025_p7 = pnand %p2023_p5, %p2020_p3 }
  0x24   : > { %2028 = shalt.err (!%p2025_p7)
}
  0x25   : > { %s2029_s17 = scalar_lea.vmem %s244_s15, 64  ;;  %p2037_p2 = scmp.lt.s32.totalorder %s244_s15, %s244_s15 }
  0x26   : > { %p2030_p10 = scmp.ne.s32.totalorder %s244_s15, %s2029_s17  ;;  %p2038_p6 = scmp.lt.s32.totalorder %s2029_s17, %s2029_s17 }
  0x28   : > { %p2032_p9 = pnand %p2030_p10, %p2354_p13  ;;  %p2039_p4 = por %p2038_p6, %p2037_p2 }
  0x2a   : > { %p2033_p1 = pneg %p2032_p9 }
  0x2c   : > { %p2040_p8 = pnand %p2039_p4, %p2033_p1 }
  0x2e   : > { %2043 = shalt.err (!%p2040_p8)
}
  0x2f   : > { %1836 = dma.hbm_to_vmem [thread:$0]  (!%p2338_p11), %s2711_s1, 64, %s244_s15, [#allocation6]  }
  0x30   : > { %s2713_s4 = sld [smem:[#allocation17_spill]] }
  0x36   : > { %s2044_s24 = scalar_lea.hbm %s2713_s4, 1024 }
  0x37   : > { %p2045_p9 = scmp.ne.s32.totalorder %s2713_s4, %s2044_s24  ;;  %p2051_p1 = scmp.lt.u32.totalorder %s2044_s24, %s2713_s4 }
  0x39   : > { %p2047_p12 = pnand %p2045_p9, %p2354_p13 }
  0x3b   : > { %p2048_p2 = pneg %p2047_p12 }
  0x3d   : > { %p2053_p4 = pnand %p2051_p1, %p2048_p2 }
  0x3f   : > { %2056 = shalt.err (!%p2053_p4)
}
  0x40   : > { %s2057_s15 = scalar_lea.vmem %s2342_s18, 1024  ;;  %p2065_p3 = scmp.lt.s32.totalorder %s2342_s18, %s2342_s18 }
  0x41   : > { %p2058_p6 = scmp.ne.s32.totalorder %s2342_s18, %s2057_s15  ;;  %p2066_p5 = scmp.lt.s32.totalorder %s2057_s15, %s2057_s15 }
  0x43   : > { %p2060_p8 = pnand %p2058_p6, %p2354_p13  ;;  %p2067_p7 = por %p2066_p5, %p2065_p3 }
  0x45   : > { %p2061_p0 = pneg %p2060_p8 }
  0x47   : > { %p2068_p10 = pnand %p2067_p7, %p2061_p0 }
  0x49   : > { %2071 = shalt.err (!%p2068_p10)
}
  0x4a   : > { %s2237_s19 = smov 64   ;;  %s2238_s21 = smov 4  }
  0x4b   : > { %1842 = dma.hbm_to_vmem [thread:$0]  (!%p2338_p11), %s2713_s4, 1024, %s2342_s18, [#allocation9], %s2237_s19, %s2237_s19, %s2238_s21  }
  0x4c   : > { %s2072_s10 = scalar_lea.hbm %s2696_s3, 3072 }
  0x4d   : > { %p2073_p9 = scmp.ne.s32.totalorder %s2696_s3, %s2072_s10  ;;  %p2079_p1 = scmp.lt.u32.totalorder %s2072_s10, %s2696_s3 }
  0x4f   : > { %p2075_p12 = pnand %p2073_p9, %p2354_p13 }
  0x51   : > { %p2076_p2 = pneg %p2075_p12 }
  0x53   : > { %p2081_p4 = pnand %p2079_p1, %p2076_p2 }
  0x55   : > { %2084 = shalt.err (!%p2081_p4)
}
  0x56   : > { %s2085_s22 = scalar_lea.vmem %s257_s20, 3072  ;;  %p2093_p3 = scmp.lt.s32.totalorder %s257_s20, %s257_s20 }
  0x57   : > { %p2086_p6 = scmp.ne.s32.totalorder %s257_s20, %s2085_s22  ;;  %p2094_p5 = scmp.lt.s32.totalorder %s2085_s22, %s2085_s22 }
  0x59   : > { %p2088_p8 = pnand %p2086_p6, %p2354_p13  ;;  %p2095_p7 = por %p2094_p5, %p2093_p3 }
  0x5b   : > { %p2089_p0 = pneg %p2088_p8 }
  0x5d   : > { %p2096_p10 = pnand %p2095_p7, %p2089_p0 }
  0x5f   : > { %2099 = shalt.err (!%p2096_p10)
}
  0x60   : > { %1839 = dma.hbm_to_vmem [thread:$0]  (!%p2338_p11), %s2696_s3, 3072, %s257_s20, [#allocation6], %s2237_s19, %s2237_s19, %s2238_s21  }
  0x61   : > { %s2239_s23 = smov [#allocation10]   ;;  %s2100_s14 = scalar_lea.hbm %s2699_s6, 1024 }
  0x62   : > { %s285_s24 = sshll.u32 %s2239_s23, 4  ;;  %p2101_p9 = scmp.ne.s32.totalorder %s2699_s6, %s2100_s14  ;;  %s286_s24 = int_to_ptr.vmem [resolvable:$true] %s285_s24 }
  0x63   : > { %p2107_p1 = scmp.lt.u32.totalorder %s2100_s14, %s2699_s6 }
  0x64   : > { %p2103_p12 = pnand %p2101_p9, %p2354_p13 }
  0x66   : > { %p2104_p2 = pneg %p2103_p12 }
  0x68   : > { %p2109_p4 = pnand %p2107_p1, %p2104_p2 }
  0x6a   : > { %2112 = shalt.err (!%p2109_p4)
}
  0x6b   : > { %s2113_s20 = scalar_lea.vmem %s286_s24, 1024  ;;  %p2121_p3 = scmp.lt.s32.totalorder %s286_s24, %s286_s24 }
  0x6c   : > { %p2114_p6 = scmp.ne.s32.totalorder %s286_s24, %s2113_s20  ;;  %p2122_p5 = scmp.lt.s32.totalorder %s2113_s20, %s2113_s20 }
  0x6e   : > { %p2116_p8 = pnand %p2114_p6, %p2354_p13  ;;  %p2123_p7 = por %p2122_p5, %p2121_p3 }
  0x70   : > { %p2117_p0 = pneg %p2116_p8 }
  0x72   : > { %p2124_p10 = pnand %p2123_p7, %p2117_p0 }
  0x74   : > { %2127 = shalt.err (!%p2124_p10)
}
  0x75   : > { %1845 = dma.hbm_to_vmem [thread:$0]  (!%p2338_p11), %s2699_s6, 1024, %s286_s24, [#allocation9], %s2237_s19, %s2237_s19, %s2238_s21  }
  0x76   : > { %s2440_s26 = sadd.s32 1, %s2232_s30   ;;  %s33_s16 = sadd.s32 1, %s2228_s29 }
  0x77   : > { %s30_s18 = ssub.s32 %s2232_s30, %s2440_s26  ;;  %p40_p13 = scmp.ne.s32.totalorder %s2228_s29, %s2224_s28 }
  0x78   : > { %p31_p9 = scmp.eq.s32.totalorder %s30_s18, 0  ;;  %p41_p12 = scmp.eq.s32.totalorder %s2232_s30, 0 }
  0x79   : > { %p2714_p2 = scmp.eq.s32.totalorder %s2310_s9, 1  ;;  %p1858_p4 = scmp.lt.s32.totalorder %s2232_s30, 2 }
  0x7a   : > { %s2456_s25 = scalar_select %p31_p9, %s2228_s29, %s33_s16  }
  0x7b   : > { %p2450_p1 = por %p2714_p2, %p40_p13  ;;  %p42_p6 = por %p41_p12, %p40_p13 }
  0x7c   : > { %s302_s10 = sand.u32 1, %s2228_s29   ;;  %s1616_s19 = sshll.u32 %s2232_s30, 10 }
  0x7d   : > { %s1536_s14 = sshll.u32 %s302_s10, 6  ;;  %s2463_s17 = scalar_lea.hbm %s2693_s0, %s1616_s19 }
  0x7e   : > { %s306_s15 = scalar_lea.vmem [#allocation2], %s1536_s14  ;;  %p2467_p11 = pnand %p1858_p4, %p42_p6 }
  0x7f   : > { %s313_s22 = sshll.u32 %s306_s15, 4  ;;  %s2471_s4 = scalar_lea.sflag [#allocation3], %s302_s10  ;;  %s2465_s22 = int_to_ptr.vmem [resolvable:$true] %s313_s22 }
  0x80   : > { %s2128_s1 = scalar_lea.hbm %s2463_s17, 1024  ;;  %p2130_p0 = pneg %p2467_p11 }
  0x81   : > { %p2129_p8 = scmp.ne.s32.totalorder %s2463_s17, %s2128_s1  ;;  %s2133_s14 = scalar_lea.hbm %s2693_s0, 2048 }
  0x82   : > { %p2134_p7 = scmp.lt.u32.totalorder %s2463_s17, %s2693_s0  ;;  %p2135_p10 = scmp.lt.u32.totalorder %s2133_s14, %s2128_s1 }
  0x83   : > { %p2131_p3 = pnand %p2130_p0, %p2129_p8  ;;  %p2137_p9 = scmp.lt.u32.totalorder %s2128_s1, %s2463_s17 }
  0x84   : > { %p2136_p13 = por %p2135_p10, %p2134_p7 }
  0x85   : > { %p2132_p5 = pneg %p2131_p3 }
  0x86   : > { %p2138_p12 = por %p2137_p9, %p2136_p13 }
  0x88   : > { %p2139_p2 = pnand %p2138_p12, %p2132_p5 }
  0x8a   : > { %2142 = shalt.err (!%p2139_p2)
}
  0x8b   : > { %s2143_s10 = scalar_lea.vmem %s2465_s22, 1024  ;;  %s2240_s24 = smov [#allocation2]  }
  0x8c   : > { %p2144_p4 = scmp.ne.s32.totalorder %s2465_s22, %s2143_s10  ;;  %s2148_s15 = sshll.u32 %s2240_s24, 4  ;;  %s2149_s15 = int_to_ptr.vmem [resolvable:$false] %s2148_s15 }
  0x8d   : > { %s2150_s16 = scalar_lea.vmem %s2149_s15, 2048  ;;  %p2151_p3 = scmp.lt.s32.totalorder %s2465_s22, %s2149_s15 }
  0x8e   : > { %p2146_p6 = pnand %p2144_p4, %p2130_p0  ;;  %p2152_p7 = scmp.lt.s32.totalorder %s2150_s16, %s2143_s10 }
  0x90   : > { %p2147_p8 = pneg %p2146_p6  ;;  %p2153_p10 = por %p2152_p7, %p2151_p3 }
  0x92   : > { %p2154_p13 = pnand %p2153_p10, %p2147_p8 }
  0x94   : > { %2157 = shalt.err (!%p2154_p13)
}
  0x95   : > { %s2241_s1 = smov 128   ;;  %s2242_s18 = smov 8  }
  0x96   : > { %1849 = dma.hbm_to_vmem [thread:$0]  (!%p2467_p11), %s2463_s17, 1024, %s2465_s22, %s2471_s4, %s2241_s1, %s2241_s1, %s2242_s18  }
  0x97   : > { %p2717_p0 = scmp.ne.s32.totalorder %s2709_s13, 0 }
  0x98   : > { %s2502_s14 = sand.u32 (!%p2717_p0), 1, %s2224_s28   ;;  %p2718_p5 = scmp.ne.s32.totalorder (!%p2717_p0), %s2707_s11, 0 }
  0x99   : > { %325 = sbr.rel (%p2717_p0) target bundleno = 1192 (0x4a8), region = 52  ;;  %s1540_s19 = sshll.u32 (!%p2717_p0), %s2502_s14, 6 }
  0x9a   : > { %s328_s21 = scalar_lea.sflag (!%p2717_p0), [#allocation3], %s2502_s14  ;;  %s2506_s10 = scalar_lea.vmem (!%p2717_p0), [#allocation2], %s1540_s19 }
  0xa0   : > { %2203 = dma.done.wait (%p2718_p5), %s328_s21, 1024  }
  0xa1   : > { %2205 = vsyncadd (%p2718_p5), %s328_s21, 4294966272  ;;  %p2719_p11 = scmp.eq.s32.totalorder %s2310_s9, 0 }
  0xa3   : > { %2207 = dma.done.wait (%p2719_p11), [#allocation6], 3136   ;;  %p2720_p9 = pmov %p2719_p11 }
  0xa5   : > { %2209 = vsyncadd (%p2720_p9), [#allocation6], 4294964160  ;;  %p2721_p12 = pmov %p2720_p9 }
  0xa6   : > { %p2722_p2 = pmov %p2720_p9 }
  0xa7   : > { %2211 = dma.done.wait (%p2721_p12), [#allocation9], 2048  }
  0xa8   : > { %2213 = vsyncadd (%p2722_p2), [#allocation9], 4294965248  ;;  %v1904_v0 = vld [vmem:[#allocation7] sm:$0xff]   ;;  %v1905_v1 = vld [vmem:[#allocation7 + $0x8] sm:$0xff]   ;;  %vm1399_vm0 = vcmask 1041409   ;;  %s1545_s21 = sshll.u32 %s2502_s14, 2 }
  0xa9   : > { %1677 = vmatprep.subr.bf16.mxu0 %v1904_v0  ;;  %v1906_v2 = vld [vmem:[#allocation7 + $0x10] sm:$0xff]   ;;  %v1907_v3 = vld [vmem:[#allocation7 + $0x18] sm:$0xff]   ;;  %v2524_v5 = vld [vmem:[%s2506_s10 + $0x8] sm:$0xff]  ;;  %vm1401_vm1 = vcmask 1042434   ;;  %s379_s11 = scalar_lea.vmem [#allocation11], %s1545_s21  ;;  %vm1403_vm2 = vcmask 1043459  }
  0xaa   : > { %1678 = vmatpush3.bf16.msra.mxu0 %v1904_v0  ;;  %v2521_v4 = vld [vmem:[%s2506_s10] sm:$0xff]  ;;  %v1913_v15 = vld [vmem:[#allocation7 + $0x48] sm:$0xff]   ;;  %v1914_v17 = vld [vmem:[#allocation7 + $0x50] sm:$0xff]   ;;  %s1421_s13 = sshll.u32 %s379_s11, 4  ;;  %s1408_s4 = scalar_lea.sflag [#allocation4], %s2502_s14  ;;  %s2651_s13 = int_to_ptr.vmem [resolvable:$true] %s1421_s13 }
  0xab   : > { %1679 = vmatprep.subr.bf16.mxu0 %v1905_v1  ;;  %v1546_v6 = vld [vmem:[#allocation5] ss:$0 sm:$0xff]  ;;  %v1908_v10 = vld [vmem:[#allocation7 + $0x20] sm:$0xff]   ;;  %v1909_v16 = vld [vmem:[#allocation7 + $0x28] sm:$0xff]   ;;  %s2243_s24 = smov [#allocation11]  }
  0xac   : > { %v395_v7 = vmul.f32 %v1546_v6, %v2521_v4  ;;  %v396_v8 = vmul.f32 %v1546_v6, %v2524_v5  ;;  %v1547_v9 = vld [vmem:[%s2695_s2] ss:$0 sm:$0xff]  ;;  %v1912_v13 = vld [vmem:[#allocation7 + $0x40] sm:$0xff]   ;;  %v2532_v18 = vld [vmem:[%s2506_s10 + $0x10] sm:$0xff]  ;;  %s2162_s15 = sshll.u32 %s2243_s24, 4  ;;  %s2163_s15 = int_to_ptr.vmem [resolvable:$false] %s2162_s15 }
  0xad   : > { %1701 = vmatprep.subr.bf16.mxu1 %v1912_v13  ;;  %v2535_v19 = vld [vmem:[%s2506_s10 + $0x18] sm:$0xff]  ;;  %v2538_v21 = vld [vmem:[%s2506_s10 + $0x20] sm:$0xff]  ;;  %v2541_v22 = vld [vmem:[%s2506_s10 + $0x28] sm:$0xff]  ;;  %v397_v25 = vmul.f32 %v1546_v6, %v2532_v18  ;;  %s2164_s16 = scalar_lea.vmem %s2163_s15, 128  ;;  %p2165_p3 = scmp.lt.s32.totalorder %s2651_s13, %s2163_s15 }
  0xae   : > { %1680 = vmatpush3.bf16.msra.mxu0 %v1905_v1  ;;  %v408_v11 = vadd.f32 %v1547_v9, %v395_v7  ;;  %v409_v12 = vadd.f32 %v1547_v9, %v396_v8  ;;  %1702 = vmatpush3.bf16.msra.mxu1 %v1912_v13  ;;  %v1910_v20 = vld [vmem:[#allocation7 + $0x30] sm:$0xff]   ;;  %v1915_v23 = vld [vmem:[#allocation7 + $0x58] sm:$0xff]   ;;  %v398_v26 = vmul.f32 %v1546_v6, %v2535_v19  ;;  %v1916_v29 = vld [vmem:[#allocation7 + $0x60] sm:$0xff]  }
  0xaf   : > { %1681 = vmatprep.subr.bf16.mxu0 %v1906_v2  ;;  %1703 = vmatprep.subr.bf16.mxu1 %v1913_v15  ;;  %v1911_v24 = vld [vmem:[#allocation7 + $0x38] sm:$0xff]   ;;  %v399_v27 = vmul.f32 %v1546_v6, %v2538_v21  ;;  %v400_v28 = vmul.f32 %v1546_v6, %v2541_v22  ;;  %v2548_v30 = vld [vmem:[%s2506_s10 + $0x30] sm:$0xff]  ;;  %v410_v32 = vadd.f32 %v1547_v9, %v397_v25  ;;  %v1920_v46 = vld [vmem:[#allocation7 + $0x80] sm:$0xff]  }
  0xb0   : > { %v416_v14 = vpack.c.bf16 %v409_v12, %v408_v11  ;;  %v2551_v31 = vld [vmem:[%s2506_s10 + $0x38] sm:$0xff]  ;;  %v411_v33 = vadd.f32 %v1547_v9, %v398_v26  ;;  %v401_v37 = vmul.f32 %v1546_v6, %v2548_v30  ;;  %v1917_v43 = vld [vmem:[#allocation7 + $0x68] sm:$0xff]   ;;  %v1924_v50 = vld [vmem:[#allocation7 + $0xa0] sm:$0xff]   ;;  %s1613_s10 = sshll.u32 %s2310_s9, 6  ;;  %s2158_s9 = scalar_lea.vmem %s2651_s13, 64 }
  0xb1   : > { %v412_v34 = vadd.f32 %v1547_v9, %v399_v27  ;;  %v413_v35 = vadd.f32 %v1547_v9, %v400_v28  ;;  %v402_v38 = vmul.f32 %v1546_v6, %v2551_v31  ;;  %v1918_v44 = vld [vmem:[#allocation7 + $0x70] sm:$0xff]   ;;  %v1919_v45 = vld [vmem:[#allocation7 + $0x78] sm:$0xff]   ;;  %v1921_v47 = vld [vmem:[#allocation7 + $0x88] sm:$0xff]   ;;  %s2649_s20 = scalar_lea.hbm %s2701_s8, %s1613_s10  ;;  %p2159_p4 = scmp.ne.s32.totalorder %s2651_s13, %s2158_s9 }
  0xb2   : > { %1682 = vmatpush3.bf16.msra.mxu0 %v1906_v2  ;;  %1693 = vmatprep.mubr.bf16.mxu0 %v416_v14  ;;  %v417_v36 = vpack.c.bf16 %v411_v33, %v410_v32  ;;  %v414_v40 = vadd.f32 %v1547_v9, %v401_v37  ;;  %v1922_v48 = vld [vmem:[#allocation7 + $0x90] sm:$0xff]   ;;  %v1923_v49 = vld [vmem:[#allocation7 + $0x98] sm:$0xff]   ;;  %v1925_v33 = vld [vmem:[#allocation7 + $0xa8] sm:$0xff]   ;;  %p2166_p7 = scmp.lt.s32.totalorder %s2164_s16, %s2158_s9 }
  0xb3   : > { %1683 = vmatprep.subr.bf16.mxu0 %v1907_v3  ;;  %1704 = vmatpush3.bf16.msra.mxu1 %v1913_v15  ;;  %v418_v39 = vpack.c.bf16 %v413_v35, %v412_v34  ;;  %v415_v41 = vadd.f32 %v1547_v9, %v402_v38  ;;  %v1556_v51 = vld [vmem:[#allocation5 + $0x1] ss:$0 sm:$0xff]  ;;  %v1926_v34 = vld [vmem:[#allocation7 + $0xb0] sm:$0xff]   ;;  %v2558_v37 = vld [vmem:[#allocation10] sm:$0xff]   ;;  %p2160_p6 = pnand %p2159_p4, %p2450_p1 }
  0xb4   : > { %1705 = vmatprep.subr.bf16.mxu1 %v1914_v17  ;;  %v1557_v53 = vld [vmem:[%s2695_s2 + $0x1] ss:$0 sm:$0xff]  ;;  %v1930_v38 = vld [vmem:[#allocation8 + $0x8] sm:$0xff]   ;;  %p2167_p10 = por %p2166_p7, %p2165_p3 }
  0xb5   : > { %v419_v42 = vpack.c.bf16 %v415_v41, %v414_v40  ;;  %v1927_v35 = vld [vmem:[#allocation7 + $0xb8] sm:$0xff]   ;;  %v1936_v41 = vld [vmem:[#allocation8 + $0x20] sm:$0xff]   ;;  %p2161_p8 = pneg %p2160_p6 }
  0xb6   : > { %1684 = vmatpush3.bf16.msra.mxu0 %v1907_v3  ;;  %v1934_v40 = vld [vmem:[#allocation8 + $0x18] sm:$0xff]  }
  0xb7   : > { %1685 = vmatprep.subr.bf16.mxu0 %v1908_v10  ;;  %1706 = vmatpush3.bf16.msra.mxu1 %v1914_v17  ;;  %p2168_p13 = pnand %p2167_p10, %p2161_p8 }
  0xb8   : > { %1707 = vmatprep.subr.bf16.mxu1 %v1915_v23 }
  0xba   : > { %1686 = vmatpush3.bf16.msra.mxu0 %v1908_v10 }
  0xbb   : > { %1687 = vmatprep.subr.bf16.mxu0 %v1909_v16  ;;  %1708 = vmatpush3.bf16.msra.mxu1 %v1915_v23 }
  0xbc   : > { %1709 = vmatprep.subr.bf16.mxu1 %v1916_v29 }
  0xbe   : > { %1688 = vmatpush3.bf16.msra.mxu0 %v1909_v16 }
  0xbf   : > { %1689 = vmatprep.subr.bf16.mxu0 %v1910_v20  ;;  %1710 = vmatpush3.bf16.msra.mxu1 %v1916_v29 }
  0xc0   : > { %1711 = vmatprep.subr.bf16.mxu1 %v1917_v43 }
  0xc2   : > { %1690 = vmatpush3.bf16.msra.mxu0 %v1910_v20 }
  0xc3   : > { %1691 = vmatprep.subr.bf16.mxu0 %v1911_v24  ;;  %1712 = vmatpush3.bf16.msra.mxu1 %v1917_v43 }
  0xc4   : > { %1713 = vmatprep.subr.bf16.mxu1 %v1918_v44 }
  0xc6   : > { %1692 = vmatpush3.bf16.msra.mxu0 %v1911_v24 }
  0xc7   : > { %1714 = vmatpush3.bf16.msra.mxu1 %v1918_v44  ;;  %1725 = vmatprep.subr.bf16.mxu0 %v1920_v46  ;;  %v1567_v44 = vld [vmem:[%s2695_s2 + $0x2] ss:$0 sm:$0xff] }
  0xc8   : > { %1715 = vmatprep.subr.bf16.mxu1 %v1919_v45 }
  0xc9   : > { %1694 = vmatmul.mubr.bf16.vlgmr.msra.gmra.mrb[0].mxu0 %v417_v36  ;;  %v1928_v36 = vld [vmem:[#allocation8] sm:$0xff]  }
  0xca   : > { %1697 = vmatprep.mubr.bf16.mxu0 %v418_v39  ;;  %1726 = vmatpush3.bf16.msra.mxu0 %v1920_v46  ;;  %v1932_v39 = vld [vmem:[#allocation8 + $0x10] sm:$0xff]  }
  0xcb   : > { %1716 = vmatpush3.bf16.msra.mxu1 %v1919_v45  ;;  %1727 = vmatprep.subr.bf16.mxu0 %v1921_v47 }
  0xcc   : > { %1749 = vmatprep.subr.bf16.mxu1 %v1928_v36 }
  0xce   : > { %1728 = vmatpush3.bf16.msra.mxu0 %v1921_v47 }
  0xcf   : > { %1729 = vmatprep.subr.bf16.mxu0 %v1922_v48 }
  0xd1   : > { %1698 = vmatmul.mubr.bf16.gmra.mrb[4].mxu0 %v419_v42  ;;  %v1566_v42 = vld [vmem:[#allocation5 + $0x2] ss:$0 sm:$0xff] }
  0xd2   : > { %1730 = vmatpush3.bf16.msra.mxu0 %v1922_v48 }
  0xd3   : > { %1731 = vmatprep.subr.bf16.mxu0 %v1923_v49 }
  0xd6   : > { %1732 = vmatpush3.bf16.msra.mxu0 %v1923_v49 }
  0xd7   : > { %1733 = vmatprep.subr.bf16.mxu0 %v1924_v50 }
  0xda   : > { %1734 = vmatpush3.bf16.msra.mxu0 %v1924_v50 }
  0xdb   : > { %1735 = vmatprep.subr.bf16.mxu0 %v1925_v33 }
  0xde   : > { %1736 = vmatpush3.bf16.msra.mxu0 %v1925_v33  ;;  %v2589_v33 = vld [vmem:[#allocation10 + $0x38] sm:$0xff]  }
  0xdf   : > { %1737 = vmatprep.subr.bf16.mxu0 %v1926_v34 }
  0xe2   : > { %1738 = vmatpush3.bf16.msra.mxu0 %v1926_v34  ;;  %v1576_v34 = vld [vmem:[#allocation5 + $0x3] ss:$0 sm:$0xff] }
  0xe3   : > { %1739 = vmatprep.subr.bf16.mxu0 %v1927_v35 }
  0xe6   : > { %1740 = vmatpush3.bf16.msra.mxu0 %v1927_v35 }
  0xe7   : > { %1773 = vmatprep.subr.bf16.mxu0 %v2558_v37 }
 0x19c   : > { %v1695_v52 = vpop.f32.mrb[0].mxu0 }
 0x19d   : > { %v556_v54 = vmul.f32 %v1695_v52, %v1556_v51  ;;  %v518_v55 = vpop.f32.mrb[1].mxu0 }
 0x19e   : > { %v554_v56 = vmul.f32 %v1556_v51, %v518_v55  ;;  %v1696_v57 = vpop.f32.mrb[2].mxu0 }
 0x19f   : > { %v569_v58 = vadd.f32 %v1557_v53, %v556_v54  ;;  %v557_v59 = vmul.f32 %v1696_v57, %v1556_v51  ;;  %v521_v60 = vpop.f32.mrb[3].mxu0 }
 0x1a0   : > { %v555_v61 = vmul.f32 %v1556_v51, %v521_v60  ;;  %v567_v62 = vadd.f32 %v1557_v53, %v554_v56 }
 0x1a1   : > { %v570_v63 = vadd.f32 %v1557_v53, %v557_v59  ;;  %v577_v1 = vmax.f32 %v569_v58, 0.0 }
 0x1a2   : > { %v568_v0 = vadd.f32 %v1557_v53, %v555_v61  ;;  %v575_v6 = vmax.f32 %v567_v62, 0.0 }
 0x1a3   : > { %v578_v2 = vmax.f32 %v570_v63, 0.0 }
 0x1a4   : > { %v1699_v3 = vpop.f32.mrb[4].mxu0  ;;  %v576_v7 = vmax.f32 %v568_v0, 0.0 }
 0x1a5   : > { %v560_v8 = vmul.f32 %v1699_v3, %v1556_v51  ;;  %v534_v9 = vpop.f32.mrb[5].mxu0  ;;  %v584_v10 = vpack.c.bf16 %v578_v2, %v577_v1 }
 0x1a6   : > { %v558_v11 = vmul.f32 %v1556_v51, %v534_v9  ;;  %v1700_v12 = vpop.f32.mrb[6].mxu0  ;;  %v583_v13 = vpack.c.bf16 %v576_v7, %v575_v6 }
 0x1a7   : > { %v573_v14 = vadd.f32 %v1557_v53, %v560_v8  ;;  %v561_v15 = vmul.f32 %v1700_v12, %v1556_v51  ;;  %v537_v16 = vpop.f32.mrb[7].mxu0  ;;  %v2564_v8 = vld [vmem:[#allocation10 + $0x8] sm:$0xff]  }
 0x1a8   : > { %v571_v17 = vadd.f32 %v1557_v53, %v558_v11  ;;  %v559_v20 = vmul.f32 %v1556_v51, %v537_v16  ;;  %1717 = vmatprep.mubr.bf16.mxu1 %v583_v13  ;;  %v2568_v16 = vld [vmem:[#allocation10 + $0x10] sm:$0xff]  }
 0x1a9   : > { %v581_v23 = vmax.f32 %v573_v14, 0.0  ;;  %v574_v24 = vadd.f32 %v1557_v53, %v561_v15  ;;  %1718 = vmatmul.mubr.bf16.vlgmr.msra.gmra.mrb[0].mxu1 %v584_v10 }
 0x1aa   : > { %v579_v25 = vmax.f32 %v571_v17, 0.0  ;;  %v572_v26 = vadd.f32 %v1557_v53, %v559_v20  ;;  %1750 = vmatpush3.bf16.msra.mxu1 %v1928_v36  ;;  %v1577_v36 = vld [vmem:[%s2695_s2 + $0x3] ss:$0 sm:$0xff] }
 0x1ab   : > { %v582_v27 = vmax.f32 %v574_v24, 0.0  ;;  %1751 = vmatprep.subr.bf16.mxu1 %v1930_v38  ;;  %v2572_v24 = vld [vmem:[#allocation10 + $0x18] sm:$0xff]  }
 0x1ac   : > { %v580_v28 = vmax.f32 %v572_v26, 0.0  ;;  %v1938_v26 = vld [vmem:[#allocation8 + $0x28] sm:$0xff]  }
 0x1ad   : > { %v586_v29 = vpack.c.bf16 %v582_v27, %v581_v23  ;;  %v2581_v27 = vld [vmem:[#allocation10 + $0x28] sm:$0xff]  }
 0x1ae   : > { %v585_v32 = vpack.c.bf16 %v580_v28, %v579_v25  ;;  %1752 = vmatpush3.bf16.msra.mxu1 %v1930_v38  ;;  %v2576_v25 = vld [vmem:[#allocation10 + $0x20] sm:$0xff]   ;;  %v1940_v28 = vld [vmem:[#allocation8 + $0x30] sm:$0xff]  }
 0x1af   : > { %1753 = vmatprep.subr.bf16.mxu1 %v1932_v39 }
 0x1b0   : > { %1721 = vmatprep.mubr.bf16.mxu1 %v585_v32  ;;  %v1942_v32 = vld [vmem:[#allocation8 + $0x38] sm:$0xff]  }
 0x1b1   : > { %1722 = vmatmul.mubr.bf16.gmra.mrb[4].mxu1 %v586_v29  ;;  %v2585_v29 = vld [vmem:[#allocation10 + $0x30] sm:$0xff]  }
 0x1b2   : > { %1754 = vmatpush3.bf16.msra.mxu1 %v1932_v39 }
 0x1b3   : > { %1755 = vmatprep.subr.bf16.mxu1 %v1934_v40 }
 0x1b6   : > { %1756 = vmatpush3.bf16.msra.mxu1 %v1934_v40 }
 0x1b7   : > { %1757 = vmatprep.subr.bf16.mxu1 %v1936_v41 }
 0x1ba   : > { %1758 = vmatpush3.bf16.msra.mxu1 %v1936_v41 }
 0x1bb   : > { %1759 = vmatprep.subr.bf16.mxu1 %v1938_v26 }
 0x1be   : > { %1760 = vmatpush3.bf16.msra.mxu1 %v1938_v26 }
 0x1bf   : > { %1761 = vmatprep.subr.bf16.mxu1 %v1940_v28 }
 0x1c2   : > { %1762 = vmatpush3.bf16.msra.mxu1 %v1940_v28 }
 0x1c3   : > { %1763 = vmatprep.subr.bf16.mxu1 %v1942_v32 }
 0x1c6   : > { %1764 = vmatpush3.bf16.msra.mxu1 %v1942_v32 }
 0x1c7   : > { %1797 = vmatprep.subr.bf16.mxu1 %v2558_v37 }
 0x27c   : > { %v1719_v43 = vpop.f32.mrb[0].mxu1 }
 0x27d   : > { %v724_v45 = vmul.f32 %v1719_v43, %v1566_v42  ;;  %v686_v46 = vpop.f32.mrb[1].mxu1 }
 0x27e   : > { %v722_v47 = vmul.f32 %v1566_v42, %v686_v46  ;;  %v1720_v48 = vpop.f32.mrb[2].mxu1 }
 0x27f   : > { %v737_v49 = vadd.f32 %v1567_v44, %v724_v45  ;;  %v725_v50 = vmul.f32 %v1720_v48, %v1566_v42  ;;  %v689_v51 = vpop.f32.mrb[3].mxu1 }
 0x280   : > { %v735_v52 = vadd.f32 %v1567_v44, %v722_v47  ;;  %v723_v53 = vmul.f32 %v1566_v42, %v689_v51 }
 0x281   : > { %v738_v54 = vadd.f32 %v1567_v44, %v725_v50  ;;  %v745_v56 = vmax.f32 %v737_v49, 0.0 }
 0x282   : > { %v736_v55 = vadd.f32 %v1567_v44, %v723_v53  ;;  %v743_v58 = vmax.f32 %v735_v52, 0.0 }
 0x283   : > { %v746_v57 = vmax.f32 %v738_v54, 0.0 }
 0x284   : > { %v744_v59 = vmax.f32 %v736_v55, 0.0  ;;  %v1723_v60 = vpop.f32.mrb[4].mxu1 }
 0x285   : > { %v752_v61 = vpack.c.bf16 %v746_v57, %v745_v56  ;;  %v728_v62 = vmul.f32 %v1723_v60, %v1566_v42  ;;  %v702_v63 = vpop.f32.mrb[5].mxu1 }
 0x286   : > { %v726_v0 = vmul.f32 %v1566_v42, %v702_v63  ;;  %v1724_v1 = vpop.f32.mrb[6].mxu1  ;;  %v751_v2 = vpack.c.bf16 %v744_v59, %v743_v58 }
 0x287   : > { %v741_v3 = vadd.f32 %v1567_v44, %v728_v62  ;;  %v729_v6 = vmul.f32 %v1724_v1, %v1566_v42  ;;  %v705_v7 = vpop.f32.mrb[7].mxu1 }
 0x288   : > { %v739_v9 = vadd.f32 %v1567_v44, %v726_v0  ;;  %v727_v10 = vmul.f32 %v1566_v42, %v705_v7  ;;  %1741 = vmatprep.mubr.bf16.mxu0 %v751_v2 }
 0x289   : > { %v749_v11 = vmax.f32 %v741_v3, 0.0  ;;  %v742_v12 = vadd.f32 %v1567_v44, %v729_v6  ;;  %1742 = vmatmul.mubr.bf16.vlgmr.msra.gmra.mrb[8].mxu0 %v752_v61 }
 0x28a   : > { %v747_v13 = vmax.f32 %v739_v9, 0.0  ;;  %v740_v14 = vadd.f32 %v1567_v44, %v727_v10  ;;  %1774 = vmatpush3.bf16.msra.mxu0 %v2558_v37 }
 0x28b   : > { %v750_v15 = vmax.f32 %v742_v12, 0.0  ;;  %1775 = vmatprep.subr.bf16.mxu0 %v2564_v8 }
 0x28c   : > { %v748_v17 = vmax.f32 %v740_v14, 0.0 }
 0x28d   : > { %v754_v20 = vpack.c.bf16 %v750_v15, %v749_v11 }
 0x28e   : > { %v753_v23 = vpack.c.bf16 %v748_v17, %v747_v13  ;;  %1776 = vmatpush3.bf16.msra.mxu0 %v2564_v8 }
 0x28f   : > { %1777 = vmatprep.subr.bf16.mxu0 %v2568_v16 }
 0x290   : > { %1745 = vmatprep.mubr.bf16.mxu0 %v753_v23 }
 0x291   : > { %1746 = vmatmul.mubr.bf16.gmra.mrb[12].mxu0 %v754_v20 }
 0x292   : > { %1778 = vmatpush3.bf16.msra.mxu0 %v2568_v16 }
 0x293   : > { %1779 = vmatprep.subr.bf16.mxu0 %v2572_v24 }
 0x296   : > { %1780 = vmatpush3.bf16.msra.mxu0 %v2572_v24 }
 0x297   : > { %1781 = vmatprep.subr.bf16.mxu0 %v2576_v25 }
 0x29a   : > { %1782 = vmatpush3.bf16.msra.mxu0 %v2576_v25 }
 0x29b   : > { %1783 = vmatprep.subr.bf16.mxu0 %v2581_v27 }
 0x29e   : > { %1784 = vmatpush3.bf16.msra.mxu0 %v2581_v27 }
 0x29f   : > { %1785 = vmatprep.subr.bf16.mxu0 %v2585_v29 }
 0x2a2   : > { %1786 = vmatpush3.bf16.msra.mxu0 %v2585_v29 }
 0x2a3   : > { %1787 = vmatprep.subr.bf16.mxu0 %v2589_v33 }
 0x2a6   : > { %1788 = vmatpush3.bf16.msra.mxu0 %v2589_v33 }
 0x35c   : > { %v1743_v35 = vpop.f32.mrb[8].mxu0 }
 0x35d   : > { %v892_v38 = vmul.f32 %v1743_v35, %v1576_v34  ;;  %v854_v39 = vpop.f32.mrb[9].mxu0 }
 0x35e   : > { %v890_v40 = vmul.f32 %v1576_v34, %v854_v39  ;;  %v1744_v41 = vpop.f32.mrb[10].mxu0 }
 0x35f   : > { %v905_v42 = vadd.f32 %v1577_v36, %v892_v38  ;;  %v893_v43 = vmul.f32 %v1744_v41, %v1576_v34  ;;  %v857_v44 = vpop.f32.mrb[11].mxu0 }
 0x360   : > { %v903_v45 = vadd.f32 %v1577_v36, %v890_v40  ;;  %v891_v46 = vmul.f32 %v1576_v34, %v857_v44 }
 0x361   : > { %v913_v47 = vmax.f32 %v905_v42, 0.0  ;;  %v906_v48 = vadd.f32 %v1577_v36, %v893_v43 }
 0x362   : > { %v911_v49 = vmax.f32 %v903_v45, 0.0  ;;  %v904_v50 = vadd.f32 %v1577_v36, %v891_v46 }
 0x363   : > { %v914_v51 = vmax.f32 %v906_v48, 0.0  ;;  %v921_v54 = vadd.f32 %v913_v47, %v2532_v18 }
 0x364   : > { %v912_v52 = vmax.f32 %v904_v50, 0.0  ;;  %v1747_v53 = vpop.f32.mrb[12].mxu0  ;;  %v919_v58 = vadd.f32 %v911_v49, %v2521_v4 }
 0x365   : > { %v922_v55 = vadd.f32 %v914_v51, %v2535_v19  ;;  %v896_v56 = vmul.f32 %v1747_v53, %v1576_v34  ;;  %v870_v57 = vpop.f32.mrb[13].mxu0 }
 0x366   : > { %v920_v59 = vadd.f32 %v912_v52, %v2524_v5  ;;  %v894_v60 = vmul.f32 %v1576_v34, %v870_v57  ;;  %v1748_v61 = vpop.f32.mrb[14].mxu0 }
 0x367   : > { %v928_v62 = vpack.c.bf16 %v922_v55, %v921_v54  ;;  %v909_v63 = vadd.f32 %v1577_v36, %v896_v56  ;;  %v897_v0 = vmul.f32 %v1748_v61, %v1576_v34  ;;  %v873_v1 = vpop.f32.mrb[15].mxu0 }
 0x368   : > { %v907_v2 = vadd.f32 %v1577_v36, %v894_v60  ;;  %v895_v3 = vmul.f32 %v1576_v34, %v873_v1  ;;  %v927_v6 = vpack.c.bf16 %v920_v59, %v919_v58 }
 0x369   : > { %v917_v7 = vmax.f32 %v909_v63, 0.0  ;;  %v910_v9 = vadd.f32 %v1577_v36, %v897_v0 }
 0x36a   : > { %v915_v18 = vmax.f32 %v907_v2, 0.0  ;;  %v908_v10 = vadd.f32 %v1577_v36, %v895_v3  ;;  %1765 = vmatprep.mubr.bf16.mxu1 %v927_v6  ;;  %1789 = vmatprep.mubr.bf16.mxu0 %v927_v6 }
 0x36b   : > { %v925_v19 = vadd.f32 %v917_v7, %v2548_v30  ;;  %v918_v4 = vmax.f32 %v910_v9, 0.0  ;;  %1766 = vmatmul.mubr.bf16.vlgmr.msra.gmra.mrb[8].mxu1 %v928_v62  ;;  %1790 = vmatmul.mubr.bf16.vlgmr.msra.gmra.mrb[16].mxu0 %v928_v62 }
 0x36c   : > { %v923_v5 = vadd.f32 %v915_v18, %v2538_v21  ;;  %v916_v11 = vmax.f32 %v908_v10, 0.0  ;;  %1805 = vmatpush3.bf16.msra.mxu1 %v2558_v37  ;;  %v1578_v21 = vld [vmem:[%s2698_s5] ss:$0 sm:$0xff] }
 0x36d   : > { %v926_v12 = vadd.f32 %v918_v4, %v2551_v31  ;;  %1798 = vmatprep.subr.bf16.mxu1 %v2564_v8 }
 0x36e   : > { %v924_v13 = vadd.f32 %v916_v11, %v2541_v22  ;;  %v2626_v22 = vld [vmem:[%s2700_s7] ss:$0 sm:$0xff] }
 0x36f   : > { %v930_v14 = vpack.c.bf16 %v926_v12, %v925_v19 }
 0x370   : > { %1806 = vmatpush3.bf16.msra.mxu1 %v2564_v8  ;;  %v929_v15 = vpack.c.bf16 %v924_v13, %v923_v5 }
 0x371   : > { %1799 = vmatprep.subr.bf16.mxu1 %v2568_v16 }
 0x372   : > { %1769 = vmatprep.mubr.bf16.mxu1 %v929_v15 }
 0x373   : > { %1770 = vmatmul.mubr.bf16.gmra.mrb[12].mxu1 %v930_v14 }
 0x374   : > { %1807 = vmatpush3.bf16.msra.mxu1 %v2568_v16  ;;  %1793 = vmatprep.mubr.bf16.mxu1 %v929_v15 }
 0x375   : > { %1800 = vmatprep.subr.bf16.mxu1 %v2572_v24 }
 0x378   : > { %1808 = vmatpush3.bf16.msra.mxu1 %v2572_v24 }
 0x379   : > { %1801 = vmatprep.subr.bf16.mxu1 %v2576_v25 }
 0x37c   : > { %1809 = vmatpush3.bf16.msra.mxu1 %v2576_v25 }
 0x37d   : > { %1802 = vmatprep.subr.bf16.mxu1 %v2581_v27 }
 0x380   : > { %1810 = vmatpush3.bf16.msra.mxu1 %v2581_v27 }
 0x381   : > { %1803 = vmatprep.subr.bf16.mxu1 %v2585_v29 }
 0x384   : > { %1811 = vmatpush3.bf16.msra.mxu1 %v2585_v29 }
 0x385   : > { %1804 = vmatprep.subr.bf16.mxu1 %v2589_v33 }
 0x388   : > { %1812 = vmatpush3.bf16.msra.mxu1 %v2589_v33 }
 0x38b   : > { %1794 = vmatmul.mubr.bf16.vlgmr.msra.gmra.mrb[16].mxu1 %v930_v14 }
 0x43e   : > { %v1767_v30 = vpop.f32.mrb[8].mxu1  ;;  %v1791_v31 = vpop.f32.mrb[16].mxu0 }
 0x43f   : > { %v1045_v37 = vadd.f32 %v1767_v30, %v1578_v21  ;;  %v1229_v8 = vadd.f32 %v1791_v31, %v2626_v22  ;;  %v1036_v16 = vpop.f32.mrb[9].mxu1  ;;  %v1220_v17 = vpop.f32.mrb[17].mxu0 }
 0x440   : > { %v1037_v20 = vadd.f32 %v1578_v21, %v1036_v16  ;;  %v1221_v23 = vadd.f32 %v2626_v22, %v1220_v17  ;;  %v1768_v24 = vpop.f32.mrb[10].mxu1  ;;  %v1792_v25 = vpop.f32.mrb[18].mxu0 }
 0x441   : > { %v1589_v26 = vmul.f32 -1.442695, %v1045_v37  ;;  %v1606_v27 = vmul.f32 -1.442695, %v1229_v8  ;;  %v1048_v28 = vadd.f32 %v1768_v24, %v1578_v21  ;;  %v1232_v29 = vadd.f32 %v1792_v25, %v2626_v22  ;;  %v1039_v32 = vpop.f32.mrb[11].mxu1  ;;  %v1223_v33 = vpop.f32.mrb[19].mxu0 }
 0x442   : > { %v1587_v34 = vmul.f32 -1.442695, %v1037_v20  ;;  %v1604_v35 = vmul.f32 -1.442695, %v1221_v23  ;;  %v1040_v36 = vadd.f32 %v1578_v21, %v1039_v32  ;;  %v1224_v38 = vadd.f32 %v2626_v22, %v1223_v33 }
 0x443   : > { %1944 = vpow2.f32 %v1589_v26  ;;  %v1590_v39 = vmul.f32 -1.442695, %v1048_v28  ;;  %v1607_v40 = vmul.f32 -1.442695, %v1232_v29 }
 0x444   : > { %1946 = vpow2.f32 %v1606_v27  ;;  %v1588_v41 = vmul.f32 -1.442695, %v1040_v36  ;;  %v1605_v42 = vmul.f32 -1.442695, %v1224_v38 }
 0x445   : > { %1948 = vpow2.f32 %v1587_v34 }
 0x446   : > { %1950 = vpow2.f32 %v1604_v35  ;;  %v1771_v43 = vpop.f32.mrb[12].mxu1 }
 0x447   : > { %1952 = vpow2.f32 %v1590_v39  ;;  %v1061_v44 = vadd.f32 %v1771_v43, %v1578_v21  ;;  %v1052_v45 = vpop.f32.mrb[13].mxu1 }
 0x448   : > { %1954 = vpow2.f32 %v1607_v40  ;;  %v1053_v46 = vadd.f32 %v1578_v21, %v1052_v45  ;;  %v1772_v47 = vpop.f32.mrb[14].mxu1 }
 0x449   : > { %1956 = vpow2.f32 %v1588_v41  ;;  %v1593_v48 = vmul.f32 -1.442695, %v1061_v44  ;;  %v1064_v49 = vadd.f32 %v1772_v47, %v1578_v21  ;;  %v1055_v50 = vpop.f32.mrb[15].mxu1 }
 0x44a   : > { %1958 = vpow2.f32 %v1605_v42  ;;  %v1591_v51 = vmul.f32 -1.442695, %v1053_v46  ;;  %v1056_v52 = vadd.f32 %v1578_v21, %v1055_v50 }
 0x44b   : > { %1960 = vpow2.f32 %v1593_v48  ;;  %v1594_v53 = vmul.f32 -1.442695, %v1064_v49 }
 0x44c   : > { %1962 = vpow2.f32 %v1591_v51  ;;  %v1592_v54 = vmul.f32 -1.442695, %v1056_v52 }
 0x44d   : > { %v1945_v55 = vpop.eup %1944  ;;  %1964 = vpow2.f32 %v1594_v53 }
 0x44e   : > { %v1947_v56 = vpop.eup %1946  ;;  %v1093_v57 = vadd.f32 1.0, %v1945_v55  ;;  %1966 = vpow2.f32 %v1592_v54 }
 0x44f   : > { %v1949_v58 = vpop.eup %1948  ;;  %v1277_v59 = vadd.f32 1.0, %v1947_v56 }
 0x450   : > { %v1951_v60 = vpop.eup %1950  ;;  %1968 = vrcp.f32 %v1093_v57  ;;  %v1091_v61 = vadd.f32 1.0, %v1949_v58 }
 0x451   : > { %v1953_v62 = vpop.eup %1952  ;;  %1970 = vrcp.f32 %v1277_v59  ;;  %v1275_v63 = vadd.f32 1.0, %v1951_v60 }
 0x452   : > { %v1955_v0 = vpop.eup %1954  ;;  %1972 = vrcp.f32 %v1091_v61  ;;  %v1094_v1 = vadd.f32 1.0, %v1953_v62 }
 0x453   : > { %v1957_v2 = vpop.eup %1956  ;;  %1974 = vrcp.f32 %v1275_v63  ;;  %v1278_v3 = vadd.f32 1.0, %v1955_v0 }
 0x454   : > { %v1959_v6 = vpop.eup %1958  ;;  %1976 = vrcp.f32 %v1094_v1  ;;  %v1092_v7 = vadd.f32 1.0, %v1957_v2 }
 0x455   : > { %v1961_v9 = vpop.eup %1960  ;;  %1978 = vrcp.f32 %v1278_v3  ;;  %v1276_v18 = vadd.f32 1.0, %v1959_v6 }
 0x456   : > { %v1963_v10 = vpop.eup %1962  ;;  %1980 = vrcp.f32 %v1092_v7  ;;  %v1097_v19 = vadd.f32 1.0, %v1961_v9 }
 0x457   : > { %v1965_v4 = vpop.eup %1964  ;;  %1982 = vrcp.f32 %v1276_v18  ;;  %v1095_v5 = vadd.f32 1.0, %v1963_v10 }
 0x458   : > { %v1967_v11 = vpop.eup %1966  ;;  %1984 = vrcp.f32 %v1097_v19  ;;  %v1098_v12 = vadd.f32 1.0, %v1965_v4 }
 0x459   : > { %1986 = vrcp.f32 %v1095_v5  ;;  %v1096_v13 = vadd.f32 1.0, %v1967_v11 }
 0x45a   : > { %v1969_v14 = vpop.eup %1968  ;;  %1988 = vrcp.f32 %v1098_v12 }
 0x45b   : > { %v1971_v15 = vpop.eup %1970  ;;  %v1301_v21 = vmax.f32 %v1969_v14, 1e-07  ;;  %1990 = vrcp.f32 %v1096_v13 }
 0x45c   : > { %v1973_v30 = vpop.eup %1972 }
 0x45d   : > { %v1975_v31 = vpop.eup %1974  ;;  %v1309_v37 = vmin.f32 %v1301_v21, 0.9999999  ;;  %v1299_v8 = vmax.f32 %v1973_v30, 1e-07 }
 0x45e   : > { %v1977_v16 = vpop.eup %1976  ;;  %v1795_v17 = vpop.f32.mrb[16].mxu1 }
 0x45f   : > { %v1979_v20 = vpop.eup %1978  ;;  %v1345_v23 = vmul.f32 %v1971_v15, %v1309_v37  ;;  %v1307_v24 = vmin.f32 %v1299_v8, 0.9999999  ;;  %v1302_v25 = vmax.f32 %v1977_v16, 1e-07  ;;  %v1245_v26 = vadd.f32 %v1795_v17, %v2626_v22  ;;  %v1236_v27 = vpop.f32.mrb[17].mxu1 }
 0x460   : > { %v1981_v28 = vpop.eup %1980  ;;  %v1237_v29 = vadd.f32 %v2626_v22, %v1236_v27  ;;  %v1796_v32 = vpop.f32.mrb[18].mxu1 }
 0x461   : > { %v1983_v33 = vpop.eup %1982  ;;  %v1343_v34 = vmul.f32 %v1975_v31, %v1307_v24  ;;  %v1310_v35 = vmin.f32 %v1302_v25, 0.9999999  ;;  %v1300_v36 = vmax.f32 %v1981_v28, 1e-07  ;;  %v1610_v38 = vmul.f32 -1.442695, %v1245_v26 }
 0x462   : > { %v1985_v39 = vpop.eup %1984  ;;  %v1608_v40 = vmul.f32 -1.442695, %v1237_v29  ;;  %v1248_v41 = vadd.f32 %v1796_v32, %v2626_v22  ;;  %v1239_v42 = vpop.f32.mrb[19].mxu1 }
 0x463   : > { %v1987_v43 = vpop.eup %1986  ;;  %v1322_v44 = vadd.f32 %v1310_v35, %v1309_v37  ;;  %v1346_v45 = vmul.f32 %v1979_v20, %v1310_v35  ;;  %v1308_v46 = vmin.f32 %v1300_v36, 0.9999999  ;;  %v1305_v47 = vmax.f32 %v1985_v39, 1e-07 }
 0x464   : > { %v1989_v48 = vpop.eup %1988  ;;  %v1303_v49 = vmax.f32 %v1987_v43, 1e-07  ;;  %1992 = vpow2.f32 %v1610_v38  ;;  %v1611_v50 = vmul.f32 -1.442695, %v1248_v41  ;;  %v1240_v51 = vadd.f32 %v2626_v22, %v1239_v42 }
 0x465   : > { %v1991_v52 = vpop.eup %1990  ;;  %v1323_v53 = vrot.slane %v1322_v44, 4  ;;  %v1358_v54 = vadd.f32 %v1346_v45, %v1345_v23  ;;  %v1315_v55 = vadd.f32 %v1308_v46, %v1307_v24  ;;  %v1344_v56 = vmul.f32 %v1983_v33, %v1308_v46 }
 0x466   : > { %v2636_v57 = vmin.f32 %v1305_v47, 0.9999999  ;;  %v1306_v58 = vmax.f32 %v1989_v48, 1e-07  ;;  %1994 = vpow2.f32 %v1608_v40  ;;  %v1304_v0 = vmax.f32 %v1991_v52, 1e-07 }
 0x467   : > { %v1324_v59 = vadd.f32 %v1323_v53, %v1322_v44  ;;  %v1359_v60 = vrot.slane %v1358_v54, 4  ;;  %v1316_v61 = vrot.slane %v1315_v55, 4  ;;  %v1351_v62 = vadd.f32 %v1344_v56, %v1343_v34 }
 0x468   : > { %v2638_v63 = vmin.f32 %v1306_v58, 0.9999999  ;;  %1996 = vpow2.f32 %v1611_v50  ;;  %v1609_v1 = vmul.f32 -1.442695, %v1240_v51  ;;  %v1311_v6 = vmin.f32 %v1303_v49, 0.9999999 }
 0x469   : > { %v1325_v2 = vrot.slane %v1324_v59, 2  ;;  %v1317_v22 = vadd.f32 %v1316_v61, %v1315_v55  ;;  %v1352_v3 = vrot.slane %v1351_v62, 4  ;;  %v1360_v7 = vadd.f32 %v1359_v60, %v1358_v54 }
 0x46a   : > { %v1336_v9 = vadd.f32 %v2638_v63, %v2636_v57  ;;  %v1312_v18 = vmin.f32 %v1304_v0, 0.9999999  ;;  %1998 = vpow2.f32 %v1609_v1 }
 0x46b   : > { %v1326_v10 = vadd.f32 %v1325_v2, %v1324_v59  ;;  %v1318_v19 = vrot.slane %v1317_v22, 2  ;;  %v1353_v4 = vadd.f32 %v1352_v3, %v1351_v62  ;;  %v1361_v15 = vrot.slane %v1360_v7, 2 }
 0x46c   : > { %v1329_v5 = vadd.f32 %v1312_v18, %v1311_v6  ;;  %v1337_v13 = vrot.slane %v1336_v9, 4 }
 0x46d   : > { %v1327_v11 = vrot.slane %v1326_v10, 1  ;;  %v1319_v12 = vadd.f32 %v1318_v19, %v1317_v22  ;;  %v1354_v16 = vrot.slane %v1353_v4, 2  ;;  %v1362_v25 = vadd.f32 %v1361_v15, %v1360_v7 }
 0x46e   : > { %v1993_v14 = vpop.eup %1992  ;;  %v1330_v31 = vrot.slane %v1329_v5, 4  ;;  %v1338_v20 = vadd.f32 %v1337_v13, %v1336_v9 }
 0x46f   : > { %v1328_v21 = vadd.f32 %v1327_v11, %v1326_v10  ;;  %v1320_v30 = vrot.slane %v1319_v12, 1  ;;  %v1281_v37 = vadd.f32 1.0, %v1993_v14  ;;  %v1355_v29 = vadd.f32 %v1354_v16, %v1353_v4 }
 0x470   : > { %v1995_v8 = vpop.eup %1994  ;;  %v1331_v26 = vadd.f32 %v1330_v31, %v1329_v5  ;;  %v1339_v32 = vrot.slane %v1338_v20, 2  ;;  %v1363_v34 = vrot.slane %v1362_v25, 1 }
 0x471   : > { %2000 = vrcp.f32 %v1328_v21  ;;  %v1321_v17 = vadd.f32 %v1320_v30, %v1319_v12  ;;  %v1279_v23 = vadd.f32 1.0, %v1995_v8  ;;  %v1356_v36 = vrot.slane %v1355_v29, 1 }
 0x472   : > { %v1997_v24 = vpop.eup %1996  ;;  %2002 = vrcp.f32 %v1281_v37  ;;  %v1332_v35 = vrot.slane %v1331_v26, 2  ;;  %v1340_v38 = vadd.f32 %v1339_v32, %v1338_v20  ;;  %v1364_v39 = vadd.f32 %v1363_v34, %v1362_v25 }
 0x473   : > { %2004 = vrcp.f32 %v1321_v17  ;;  %v1282_v27 = vadd.f32 1.0, %v1997_v24  ;;  %v1357_v43 = vadd.f32 %v1356_v36, %v1355_v29 }
 0x474   : > { %v1999_v28 = vpop.eup %1998  ;;  %2006 = vrcp.f32 %v1279_v23  ;;  %v1333_v41 = vadd.f32 %v1332_v35, %v1331_v26  ;;  %v1341_v46 = vrot.slane %v1340_v38, 1 }
 0x475   : > { %2008 = vrcp.f32 %v1282_v27  ;;  %v1280_v33 = vadd.f32 1.0, %v1999_v28 }
 0x476   : > { %v1334_v52 = vrot.slane %v1333_v41, 1  ;;  %v1342_v59 = vadd.f32 %v1341_v46, %v1340_v38 }
 0x477   : > { %2010 = vrcp.f32 %v1280_v33 }
 0x478   : > { %v1335_v0 = vadd.f32 %v1334_v52, %v1333_v41  ;;  %2012 = vrcp.f32 %v1342_v59 }
 0x47a   : > { %2014 = vrcp.f32 %v1335_v0 }
 0x47b   : > { %v2001_v40 = vpop.eup %2000 }
 0x47c   : > { %v2003_v42 = vpop.eup %2002  ;;  %v1384_v44 = vmul.f32 %v2001_v40, %v1364_v39 }
 0x47d   : > { %v2005_v45 = vpop.eup %2004  ;;  %v1349_v47 = vmul.f32 %v2003_v42, %v2636_v57 }
 0x47e   : > { %v2007_v48 = vpop.eup %2006  ;;  %v1383_v49 = vmul.f32 %v2005_v45, %v1357_v43  ;;  %v1388_v50 = vmax.f32 %v1384_v44, 0.0 }
 0x47f   : > { %v2009_v51 = vpop.eup %2008  ;;  %v1347_v53 = vmul.f32 %v2007_v48, %v1311_v6 }
 0x480   : > { %v1350_v54 = vmul.f32 %v2009_v51, %v2638_v63  ;;  %v1387_v55 = vmax.f32 %v1383_v49, 0.0  ;;  %v1392_v56 = vmin.f32 %v1388_v50, 1.0 }
 0x481   : > { %v2011_v58 = vpop.eup %2010 }
 0x482   : > { %v1372_v60 = vadd.f32 %v1350_v54, %v1349_v47  ;;  %v1348_v61 = vmul.f32 %v2011_v58, %v1312_v18  ;;  %v1391_v62 = vmin.f32 %v1387_v55, 1.0  ;;  %v2013_v18 = vpop.eup %2012 }
 0x484   : > { %v1373_v1 = vrot.slane %v1372_v60, 4  ;;  %v1365_v57 = vadd.f32 %v1348_v61, %v1347_v53  ;;  %v1400_v2 = vsel %vm1399_vm0, %v1392_v56, %v1391_v62  ;;  %v2015_v13 = vpop.eup %2014 }
 0x486   : > { %v1366_v22 = vrot.slane %v1365_v57, 4  ;;  %v1374_v3 = vadd.f32 %v1373_v1, %v1372_v60 }
 0x488   : > { %v1367_v6 = vadd.f32 %v1366_v22, %v1365_v57  ;;  %v1375_v7 = vrot.slane %v1374_v3, 2 }
 0x48a   : > { %v1368_v63 = vrot.slane %v1367_v6, 2  ;;  %v1376_v9 = vadd.f32 %v1375_v7, %v1374_v3 }
 0x48c   : > { %v1369_v10 = vadd.f32 %v1368_v63, %v1367_v6  ;;  %v1377_v19 = vrot.slane %v1376_v9, 1 }
 0x48e   : > { %v1370_v4 = vrot.slane %v1369_v10, 1  ;;  %v1378_v5 = vadd.f32 %v1377_v19, %v1376_v9 }
 0x490   : > { %v1371_v11 = vadd.f32 %v1370_v4, %v1369_v10  ;;  %v1386_v12 = vmul.f32 %v2013_v18, %v1378_v5 }
 0x492   : > { %v1385_v14 = vmul.f32 %v2015_v13, %v1371_v11  ;;  %v1390_v15 = vmax.f32 %v1386_v12, 0.0 }
 0x494   : > { %v1389_v21 = vmax.f32 %v1385_v14, 0.0  ;;  %v1394_v31 = vmin.f32 %v1390_v15, 1.0 }
 0x496   : > { %v1393_v30 = vmin.f32 %v1389_v21, 1.0 }
 0x498   : > { %v1402_v37 = vsel %vm1401_vm1, %v1393_v30, %v1400_v2 }
 0x499   : > { %v1404_v8 = vsel %vm1403_vm2, %v1394_v31, %v1402_v37 }
 0x49a   : > { %1406 = vst [vmem:[%s379_s11] sm:$0xf] %v1404_v8 }
 0x49b   : > { %2171 = shalt.err (!%p2168_p13)
}
 0x49c   : > { %s2172_s14 = scalar_lea.hbm %s2649_s20, 64  ;;  %s2176_s19 = scalar_lea.hbm %s2701_s8, 128 }
 0x49d   : > { %p2173_p0 = scmp.ne.s32.totalorder %s2649_s20, %s2172_s14  ;;  %p2177_p9 = scmp.lt.u32.totalorder %s2649_s20, %s2701_s8 }
 0x49e   : > { %p2178_p12 = scmp.lt.u32.totalorder %s2176_s19, %s2172_s14  ;;  %p2180_p4 = scmp.lt.u32.totalorder %s2172_s14, %s2649_s20 }
 0x49f   : > { %p2174_p5 = pnand %p2173_p0, %p2450_p1 }
 0x4a0   : > { %p2179_p2 = por %p2178_p12, %p2177_p9 }
 0x4a1   : > { %p2175_p11 = pneg %p2174_p5 }
 0x4a2   : > { %p2181_p6 = por %p2180_p4, %p2179_p2 }
 0x4a4   : > { %p2182_p8 = pnand %p2181_p6, %p2175_p11 }
 0x4a6   : > { %2185 = shalt.err (!%p2182_p8)
}
 0x4a7   : > { %1831 = dma.vmem_to_hbm [thread:$0]  (%p2450_p1), %s2651_s13, 64, %s2649_s20, %s1408_s4  }
 0x4a8 PF: > { %s1433_s11 = sand.u32 1, %s2220_s27   ;;  %p2723_p3 = scmp.ne.s32.totalorder %s2708_s12, 0 }
 0x4a9   : > { %p2724_p7 = scmp.ge.s32.totalorder %s2232_s30, 2  ;;  %s1434_s17 = scalar_lea.sflag [#allocation4], %s1433_s11 }
 0x4ab   : > { %p1851_p10 = pnand %p2724_p7, %p2723_p3 }
 0x4ad   : > { %2215 = dma.done.wait (!%p1851_p10), %s1434_s17, 64  }
 0x4ae   : > { %2217 = vsyncadd (!%p1851_p10), %s1434_s17, 4294967232  ;;  %p23_p13 = scmp.ge.s32.totalorder %s2440_s26, 4   ;;  %s2725_s27 = smov %s2224_s28 }
 0x4af   : > { %s2726_s28 = smov %s2228_s29  ;;  %s2727_s29 = smov %s2456_s25 }
 0x4b0   : > { %s2728_s30 = smov %s2440_s26  ;;  %25 = sbr.rel (!%p23_p13) target bundleno = 10 (0xa), region = 115 }
 0x4b7   :  { %1439 = vsyncpa [#allocation3], 1 }
 0x4b8   :  { %1441 = vsyncpa [#allocation3 + $0x1], 1 }
 0x4b9   :  { %1442 = vsyncpa [#allocation6], 1 }
 0x4ba   :  { %1443 = vsyncpa [#allocation9], 1 }
 0x4bb   :  { %1444 = vsyncpa [#allocation4], 1 }
 0x4bc   :  { %1446 = vsyncpa [#allocation4 + $0x1], 1 }

</bundles_post_ra>
